<compile_context>
chip_gen: v6e
topology: v6e:2x2x1
jax: 0.10.0
libtpu: 0.0.40
codegen_flags: <defaults>
</compile_context>

<pallas_src>
import functools
import math

import jax
import jax.numpy as jnp
import numpy as np
from jax.experimental import pallas as pl
from jax.experimental.pallas import tpu as pltpu


def _round_up(x, m):
    return (x + m - 1) // m * m


def _cdiv(a, b):
    return (a + b - 1) // b


def _vmem_limit_bytes():
    cap = 128 * 1024 * 1024
    try:
        info = pltpu.get_tpu_info()
        cap = int(getattr(info, "vmem_capacity_bytes", cap))
    except Exception:
        pass
    if cap <= 64 * 1024 * 1024:
        # v7x-class (64 MiB / TensorCore): leave room for compiler scratch.
        return int(min(40 * 1024 * 1024, (3 * cap) // 4))
    return 64 * 1024 * 1024        # v5e / v6e: 128 MiB physical VMEM


def _grid_sample_kernel(kmin_ref, kmax_ref, x_ref, uv_ref, o_ref, acc_ref, *,
                        H, W, tile_k, sub_k, n_ptiles, padding_mode,
                        compute_dtype):
    """Grid step: batch n, output-pixel tile p, k-th *active* HW block."""
    n = pl.program_id(0)
    p = pl.program_id(1)
    k = pl.program_id(2)
    nk_steps = pl.num_programs(2)

    @pl.when(k == 0)
    def _init():
        acc_ref[...] = jnp.zeros_like(acc_ref)

    t = n * n_ptiles + p
    lo = kmin_ref[t]
    hi = kmax_ref[t]
    # K grid axis is remapped onto this tile's active block window [lo, hi];
    # the grid extent is the (static) max span over all tiles, so idle steps
    # only pay this guard instead of a full HW/tile_k sweep.
    active = k <= (hi - lo)

    @pl.when(active)
    def _accumulate():
        tp = uv_ref.shape[-1]
        k_base = (lo + k) * tile_k

        u = uv_ref[0, 0:1, :]                      # (1, tp) absolute x (col)
        v = uv_ref[0, 1:2, :]                      # (1, tp) absolute y (row)
        x0f = jnp.floor(u)
        y0f = jnp.floor(v)
        fx = u - x0f
        fy = v - y0f
        # Clamp corner base indices so yi*W + xi never overflows int32 even
        # for huge coordinates.  Range [-2, W] keeps "both corners OOB" true
        # for any coordinate < -1 or >= W (so no spurious valid corners).
        x0 = jnp.clip(jnp.clip(x0f, -2.0, float(W)).astype(jnp.int32), -2, W)
        y0 = jnp.clip(jnp.clip(y0f, -2.0, float(H)).astype(jnp.int32), -2, H)

        def corner(dx, dy, w):
            xi = x0 + dx
            yi = y0 + dy
            if padding_mode == "border":
                xi = jnp.clip(xi, 0, W - 1)
                yi = jnp.clip(yi, 0, H - 1)
            else:  # "zeros": out-of-bounds corners contribute nothing
                valid = (xi >= 0) & (xi < W) & (yi >= 0) & (yi < H)
                w = jnp.where(valid, w, 0.0)
                xi = jnp.clip(xi, 0, W - 1)        # keep flat index bounded
                yi = jnp.clip(yi, 0, H - 1)
            rel = yi * W + xi - k_base             # block-relative flat index
            return rel, w.astype(compute_dtype)    # each (1, tp)

        corners = [corner(0, 0, (1.0 - fx) * (1.0 - fy)),
                   corner(1, 0, fx * (1.0 - fy)),
                   corner(0, 1, (1.0 - fx) * fy),
                   corner(1, 1, fx * fy)]

        # Build the one-hot weight matrix in sub_k-row slabs (instead of a
        # full (tile_k, tp) slab) so live intermediates stay small; weights
        # are built directly in the MXU compute dtype (bf16 on v6e/v7x; on
        # v5e prefer use_bf16_matmul=False since its VPU has no native bf16).
        row = jax.lax.broadcasted_iota(jnp.int32, (sub_k, tp), 0)
        for s in range(tile_k // sub_k):
            off = s * sub_k
            wslab = None
            for rel, w in corners:
                term = jnp.where(row == (rel - off), w, jnp.zeros_like(w))
                wslab = term if wslab is None else wslab + term
            img = x_ref[0, :, off:off + sub_k]     # (C_pad, sub_k) compute dtype
            acc_ref[...] += jnp.dot(img, wslab,
                                    preferred_element_type=jnp.float32)

    @pl.when(k == nk_steps - 1)
    def _finalize():
        o_ref[0] = acc_ref[...].astype(o_ref.dtype)


def warping_module_forward(x, uv_map, *, max_side_length=None, mode="bilinear",
                           padding_mode="zeros", tile_p=None, tile_k=None,
                           use_bf16_matmul=True, max_k_span=None):
    """Pallas implementation of WarpingModule.forward(x, uv_map)."""
    if uv_map is None:
        return x                      # module skips warping when uv_map is None
    if isinstance(uv_map, (list, tuple)):
        assert len(uv_map) == 1, "Not support Sequence > 1"
        uv_map = uv_map[0]
    assert mode == "bilinear", "only bilinear implemented"
    assert padding_mode in ("zeros", "border")
    # TODO(synk): grid_quant_stub is identity in float mode; qint16 fake-quant
    # of the grid (scale = 1 / (1 << coord_shift)) is not modeled here.
    if max_side_length is not None:
        coord_bit_num = math.ceil(math.log(max_side_length + 1, 2))
        coord_shift = max(min(15 - coord_bit_num, 8), 0)
        _ = 1.0 / (1 << coord_shift)   # grid_quant_scale (unused in float mode)

    N, C, H, W = x.shape
    _, Ho, Wo, two = uv_map.shape
    assert two == 2
    HW = H * W
    P = Ho * Wo
    assert HW < 2 ** 31 and P < 2 ** 31, "flat indices must fit in int32"

    # ---- Tile selection (lane-dense: multiples of 128). ---------------------
    if tile_p is None:
        tile_p = min(512, _round_up(P, 128))
        if N == 1 and _round_up(P, tile_p) // tile_p < 2 and P > 128:
            # v7x has 2 TensorCores: keep the parallel extent >= 2 when N==1.
            tile_p = _round_up(_cdiv(P, 2), 128)
    if tile_k is None:
        tile_k = min(256, _round_up(HW, 128))   # 256 keeps wmat slabs small
    tile_p = _round_up(tile_p, 128)
    tile_k = _round_up(tile_k, 128)
    sub_k = min(128, tile_k)
    P_pad = _round_up(P, tile_p)
    HW_pad = _round_up(HW, tile_k)
    n_ptiles = P_pad // tile_p
    nk = HW_pad // tile_k
    C_pad = _round_up(C, 8)

    # ---- Inputs: x flattened over HW (C & HW zero padded), uv as (N, 2, P). --
    compute_dtype = jnp.bfloat16 if use_bf16_matmul else jnp.float32
    x_flat = x.reshape(N, C, HW)
    x_flat = jnp.pad(x_flat, ((0, 0), (0, C_pad - C), (0, HW_pad - HW)))
    x_flat = x_flat.astype(compute_dtype)       # pre-cast: halves x DMA bytes
    uv = jnp.moveaxis(uv_map.reshape(N, P, 2).astype(jnp.float32), -1, 1)
    if P_pad > P:
        # padded coords land fully out of bounds -> zero weights, no NaNs
        uv = jnp.pad(uv, ((0, 0), (0, 0), (0, P_pad - P)), constant_values=-2.0)

    # ---- Scalar-prefetch K-skip tables: per (n, p-tile) min/max HW block that
    # contains any valid bilinear corner of that output tile (flattened 1-D to
    # keep SMEM padding small).  Padded output pixels never widen the range.
    u_all = uv[:, 0, :]
    v_all = uv[:, 1, :]
    x0 = jnp.clip(jnp.clip(jnp.floor(u_all), -2.0, float(W)).astype(jnp.int32),
                  -2, W)
    y0 = jnp.clip(jnp.clip(jnp.floor(v_all), -2.0, float(H)).astype(jnp.int32),
                  -2, H)
    pix_valid = (jnp.arange(P_pad) < P)[None, :]
    idx_min = jnp.full((N, P_pad), HW, dtype=jnp.int32)
    idx_max = jnp.full((N, P_pad), -1, dtype=jnp.int32)
    for dx in (0, 1):
        for dy in (0, 1):
            xi = x0 + dx
            yi = y0 + dy
            if padding_mode == "border":
                valid = pix_valid & jnp.ones(xi.shape, dtype=bool)
            else:
                valid = ((xi >= 0) & (xi < W) & (yi >= 0) & (yi < H)
                         & pix_valid)
            xi = jnp.clip(xi, 0, W - 1)
            yi = jnp.clip(yi, 0, H - 1)
            idx = yi * W + xi
            idx_min = jnp.minimum(idx_min, jnp.where(valid, idx, HW))
            idx_max = jnp.maximum(idx_max, jnp.where(valid, idx, -1))
    idx_min = idx_min.reshape(N, n_ptiles, tile_p).min(axis=-1)
    idx_max = idx_max.reshape(N, n_ptiles, tile_p).max(axis=-1)
    kmin_blk = jnp.clip(idx_min // tile_k, 0, nk - 1).astype(jnp.int32).reshape(-1)
    kmax_blk = jnp.clip(idx_max // tile_k, -1, nk - 1).astype(jnp.int32).reshape(-1)

    # ---- Static K extent = max active span over all tiles. -------------------
    if max_k_span is None:
        try:
            max_k_span = int(jnp.max(jnp.maximum(kmax_blk - kmin_blk + 1, 0)))
        except Exception:
            # TODO(synk): under jit the span is a tracer; pass max_k_span
            # explicitly to keep the remapped-K win.  Fall back to full extent.
            max_k_span = nk
    max_k_span = int(min(max(int(max_k_span), 1), nk))

    kernel = functools.partial(
        _grid_sample_kernel, H=H, W=W, tile_k=tile_k, sub_k=sub_k,
        n_ptiles=n_ptiles, padding_mode=padding_mode,
        compute_dtype=compute_dtype)

    def x_index_map(n, p, k, kmin_ref, kmax_ref):
        # Remap k onto this tile's active window; inactive steps re-use the
        # last resident block (same block index -> no extra DMA issued).
        t = n * n_ptiles + p
        lo = kmin_ref[t]
        hi = jnp.maximum(kmax_ref[t], lo)
        return (n, 0, jnp.minimum(lo + k, hi))

    out = pl.pallas_call(
        kernel,
        out_shape=jax.ShapeDtypeStruct((N, C_pad, P_pad), x.dtype),
        grid_spec=pltpu.PrefetchScalarGridSpec(
            num_scalar_prefetch=2,
            grid=(N, n_ptiles, max_k_span),
            in_specs=[
                pl.BlockSpec((1, C_pad, tile_k), x_index_map),
                pl.BlockSpec((1, 2, tile_p),
                             lambda n, p, k, kmin, kmax: (n, 0, p)),
            ],
            out_specs=pl.BlockSpec((1, C_pad, tile_p),
                                   lambda n, p, k, kmin, kmax: (n, 0, p)),
            scratch_shapes=[pltpu.VMEM((C_pad, tile_p), jnp.float32)],
        ),
        compiler_params=pltpu.CompilerParams(
            dimension_semantics=("parallel", "parallel", "arbitrary"),
            vmem_limit_bytes=_vmem_limit_bytes(),
        ),
    )(kmin_blk, kmax_blk, x_flat, uv)

    return out[:, :C, :P].reshape(N, C, Ho, Wo)


def _reference_grid_sample(x, uv_map, padding_mode="zeros"):
    """Pure-JAX reference (absolute-coordinate bilinear grid sample)."""
    N, C, H, W = x.shape
    u = uv_map[..., 0]
    v = uv_map[..., 1]
    x0 = jnp.floor(u).astype(jnp.int32)
    y0 = jnp.floor(v).astype(jnp.int32)
    fx = u - x0
    fy = v - y0

    def gather(xi, yi):
        if padding_mode == "border":
            valid = jnp.ones_like(xi, dtype=jnp.float32)
        else:
            valid = ((xi >= 0) & (xi < W) & (yi >= 0) & (yi < H)).astype(
                jnp.float32)
        xi_c = jnp.clip(xi, 0, W - 1)
        yi_c = jnp.clip(yi, 0, H - 1)
        batch_idx = jnp.arange(N)[:, None, None]
        vals = x[batch_idx, :, yi_c, xi_c]          # (N, Ho, Wo, C)
        vals = jnp.moveaxis(vals, -1, 1)            # (N, C, Ho, Wo)
        return vals * valid[:, None, :, :]

    w00 = ((1 - fx) * (1 - fy))[:, None]
    w10 = (fx * (1 - fy))[:, None]
    w01 = ((1 - fx) * fy)[:, None]
    w11 = (fx * fy)[:, None]
    return (gather(x0, y0) * w00
            + gather(x0 + 1, y0) * w10
            + gather(x0, y0 + 1) * w01
            + gather(x0 + 1, y0 + 1) * w11)


if __name__ == "__main__":
    key = jax.random.PRNGKey(0)
    k1, k2 = jax.random.split(key, 2)

    N, C, H, W = 2, 4, 16, 16
    Ho, Wo = 16, 16

    x = jax.random.normal(k1, (N, C, H, W), dtype=jnp.float32)

    # Identity-ish warp in absolute pixel coords with random offsets; some
    # samples fall slightly out of bounds to exercise zeros padding.
    base_x = jnp.tile(jnp.arange(Wo, dtype=jnp.float32)[None, :], (Ho, 1))
    base_y = jnp.tile(jnp.arange(Ho, dtype=jnp.float32)[:, None], (1, Wo))
    base = jnp.stack([base_x, base_y], axis=-1)                 # (Ho, Wo, 2)
    offsets = jax.random.uniform(k2, (N, Ho, Wo, 2), dtype=jnp.float32,
                                 minval=-1.5, maxval=1.5)
    uv_map = base[None] + offsets                               # (N, Ho, Wo, 2)

    ref = _reference_grid_sample(x, uv_map, padding_mode="zeros")

    # 1) Full-precision path (f32 MXU), automatic tile sizes.
    out = warping_module_forward(
        x, uv_map, max_side_length=max(H, W), mode="bilinear",
        padding_mode="zeros", use_bf16_matmul=False)
    jax.block_until_ready(out)
    np.testing.assert_allclose(np.asarray(out), np.asarray(ref),
                               rtol=1e-5, atol=1e-5)

    # 2) bf16-MXU fast path with small forced tiles so the multi-tile
    #    accumulator / pipeline / K-span machinery is exercised at this size.
    #    Error vs the f32 reference is relative (~2^-8 of the data scale).
    out_bf16 = warping_module_forward(
        x, uv_map, max_side_length=max(H, W), mode="bilinear",
        padding_mode="zeros", use_bf16_matmul=True, tile_p=128, tile_k=128)
    jax.block_until_ready(out_bf16)
    np.testing.assert_allclose(np.asarray(out_bf16), np.asarray(ref),
                               rtol=3e-2, atol=5e-2)

    # 3) Border padding mode (supported module option).
    ref_b = _reference_grid_sample(x, uv_map, padding_mode="border")
    out_b = warping_module_forward(
        x, uv_map, mode="bilinear", padding_mode="border",
        use_bf16_matmul=False, tile_p=128, tile_k=128)
    jax.block_until_ready(out_b)
    np.testing.assert_allclose(np.asarray(out_b), np.asarray(ref_b),
                               rtol=1e-5, atol=1e-5)

    # 4) Warp whose top half maps fully out of bounds: exercises the remapped
    #    K axis, fully-inactive tiles (guard false for every step) and the
    #    zeros-padding output path.
    uv_shift = uv_map + jnp.array([0.0, -10.0], dtype=jnp.float32)
    ref_s = _reference_grid_sample(x, uv_shift, padding_mode="zeros")
    out_s = warping_module_forward(
        x, uv_shift, max_side_length=max(H, W), mode="bilinear",
        padding_mode="zeros", use_bf16_matmul=False, tile_p=128, tile_k=128)
    jax.block_until_ready(out_s)
    np.testing.assert_allclose(np.asarray(out_s), np.asarray(ref_s),
                               rtol=1e-5, atol=1e-5)

    print("KERNEL_OK")
</pallas_src>

<mosaic_0001>
module attributes {stable_mosaic.version = 11 : i64} {
  func.func @_grid_sample_kernel(%arg0: i32, %arg1: i32, %arg2: i32, %arg3: memref<2xi32, #tpu.memory_space<smem>>, %arg4: memref<2xi32, #tpu.memory_space<smem>>, %arg5: memref<1x8x256xf32, #tpu.memory_space<vmem>>, %arg6: memref<1x2x256xf32, #tpu.memory_space<vmem>>, %arg7: memref<1x8x256xf32, #tpu.memory_space<vmem>>, %arg8: memref<8x256xf32, #tpu.memory_space<vmem>>) attributes {dimension_semantics = [#tpu.dimension_semantics<parallel>, #tpu.dimension_semantics<parallel>, #tpu.dimension_semantics<arbitrary>], iteration_bounds = array<i64: 2, 1, 1>, scalar_prefetch = 2 : i64, scratch_operands = 1 : i64, tpu.core_type = #tpu.core_type<tc>, window_params = [{transform_indices = @transform_0, window_bounds = array<i64: 1, 8, 256>}, {transform_indices = @transform_1, window_bounds = array<i64: 1, 2, 256>}, {transform_indices = @transform_2, window_bounds = array<i64: 1, 8, 256>}]} {
    %c0_i32 = arith.constant 0 : i32
    %0 = arith.cmpi eq, %arg2, %c0_i32 : i32
    %1 = arith.extui %0 : i1 to i32
    %c0_i32_0 = arith.constant 0 : i32
    %2 = arith.cmpi ne, %1, %c0_i32_0 : i32
    scf.if %2 {
      %cst = arith.constant 0.000000e+00 : f32
      %16 = vector.broadcast %cst : f32 to vector<8x256xf32>
      %c0 = arith.constant 0 : index
      %c0_4 = arith.constant 0 : index
      %17 = vector.load %arg8[%c0, %c0_4] : memref<8x256xf32, #tpu.memory_space<vmem>>, vector<8x256xf32>
      tpu.vector_store %arg8[%c0, %c0_4], %16 {strides = array<i32>} : memref<8x256xf32, #tpu.memory_space<vmem>>, vector<8x256xf32>,
    } else {
    }
    %c1_i32 = arith.constant 1 : i32
    %3 = arith.muli %arg0, %c1_i32 : i32
    %4 = arith.addi %3, %arg1 : i32
    %5 = arith.index_cast %4 : i32 to index
    %6 = memref.load %arg3[%5] : memref<2xi32, #tpu.memory_space<smem>>
    %7 = arith.index_cast %4 : i32 to index
    %8 = memref.load %arg4[%7] : memref<2xi32, #tpu.memory_space<smem>>
    %9 = arith.subi %8, %6 : i32
    %10 = arith.cmpi sle, %arg2, %9 : i32
    %11 = arith.extui %10 : i1 to i32
    %c0_i32_1 = arith.constant 0 : i32
    %12 = arith.cmpi ne, %11, %c0_i32_1 : i32
    scf.if %12 {
      %16 = arith.addi %6, %arg2 : i32
      %c256_i32 = arith.constant 256 : i32
      %17 = arith.muli %16, %c256_i32 : i32
      %c0 = arith.constant 0 : index
      %c0_4 = arith.constant 0 : index
      %c0_5 = arith.constant 0 : index
      %18 = vector.load %arg6[%c0, %c0_4, %c0_5] : memref<1x2x256xf32, #tpu.memory_space<vmem>>, vector<1x1x256xf32>
      %19 = vector.shape_cast %18 : vector<1x1x256xf32> to vector<1x256xf32>
      %c0_6 = arith.constant 0 : index
      %c1 = arith.constant 1 : index
      %c0_7 = arith.constant 0 : index
      %20 = vector.load %arg6[%c0_6, %c1, %c0_7] : memref<1x2x256xf32, #tpu.memory_space<vmem>>, vector<1x1x256xf32>
      %21 = vector.shape_cast %20 : vector<1x1x256xf32> to vector<1x256xf32>
      %22 = math.floor %19 : vector<1x256xf32>
      %23 = math.floor %21 : vector<1x256xf32>
      %24 = arith.subf %19, %22 : vector<1x256xf32>
      %25 = arith.subf %21, %23 : vector<1x256xf32>
      %cst = arith.constant -2.000000e+00 : f32
      %cst_8 = arith.constant 1.600000e+01 : f32
      %26 = vector.broadcast %cst : f32 to vector<1x256xf32>
      %27 = arith.maximumf %26, %22 : vector<1x256xf32>
      %28 = vector.broadcast %cst_8 : f32 to vector<1x256xf32>
      %29 = arith.minimumf %28, %27 : vector<1x256xf32>
      %30 = arith.fptosi %29 : vector<1x256xf32> to vector<1x256xi32>
      %c-2_i32 = arith.constant -2 : i32
      %c16_i32 = arith.constant 16 : i32
      %31 = vector.broadcast %c-2_i32 : i32 to vector<1x256xi32>
      %32 = arith.maxsi %31, %30 : vector<1x256xi32>
      %33 = vector.broadcast %c16_i32 : i32 to vector<1x256xi32>
      %34 = arith.minsi %33, %32 : vector<1x256xi32>
      %cst_9 = arith.constant -2.000000e+00 : f32
      %cst_10 = arith.constant 1.600000e+01 : f32
      %35 = vector.broadcast %cst_9 : f32 to vector<1x256xf32>
      %36 = arith.maximumf %35, %23 : vector<1x256xf32>
      %37 = vector.broadcast %cst_10 : f32 to vector<1x256xf32>
      %38 = arith.minimumf %37, %36 : vector<1x256xf32>
      %39 = arith.fptosi %38 : vector<1x256xf32> to vector<1x256xi32>
      %c-2_i32_11 = arith.constant -2 : i32
      %c16_i32_12 = arith.constant 16 : i32
      %40 = vector.broadcast %c-2_i32_11 : i32 to vector<1x256xi32>
      %41 = arith.maxsi %40, %39 : vector<1x256xi32>
      %42 = vector.broadcast %c16_i32_12 : i32 to vector<1x256xi32>
      %43 = arith.minsi %42, %41 : vector<1x256xi32>
      %cst_13 = arith.constant 1.000000e+00 : f32
      %44 = vector.broadcast %cst_13 : f32 to vector<1x256xf32>
      %45 = arith.subf %44, %24 : vector<1x256xf32>
      %cst_14 = arith.constant 1.000000e+00 : f32
      %46 = vector.broadcast %cst_14 : f32 to vector<1x256xf32>
      %47 = arith.subf %46, %25 : vector<1x256xf32>
      %48 = arith.mulf %45, %47 : vector<1x256xf32>
      %c0_i32_15 = arith.constant 0 : i32
      %49 = vector.broadcast %c0_i32_15 : i32 to vector<1x256xi32>
      %50 = arith.addi %34, %49 : vector<1x256xi32>
      %c0_i32_16 = arith.constant 0 : i32
      %51 = vector.broadcast %c0_i32_16 : i32 to vector<1x256xi32>
      %52 = arith.addi %43, %51 : vector<1x256xi32>
      %c0_i32_17 = arith.constant 0 : i32
      %53 = vector.broadcast %c0_i32_17 : i32 to vector<1x256xi32>
      %54 = arith.cmpi sge, %50, %53 : vector<1x256xi32>
      %c16_i32_18 = arith.constant 16 : i32
      %55 = vector.broadcast %c16_i32_18 : i32 to vector<1x256xi32>
      %56 = arith.cmpi slt, %50, %55 : vector<1x256xi32>
      %57 = arith.andi %54, %56 : vector<1x256xi1>
      %c0_i32_19 = arith.constant 0 : i32
      %58 = vector.broadcast %c0_i32_19 : i32 to vector<1x256xi32>
      %59 = arith.cmpi sge, %52, %58 : vector<1x256xi32>
      %60 = arith.andi %57, %59 : vector<1x256xi1>
      %c16_i32_20 = arith.constant 16 : i32
      %61 = vector.broadcast %c16_i32_20 : i32 to vector<1x256xi32>
      %62 = arith.cmpi slt, %52, %61 : vector<1x256xi32>
      %63 = arith.andi %60, %62 : vector<1x256xi1>
      %cst_21 = arith.constant 0.000000e+00 : f32
      %64 = vector.broadcast %cst_21 : f32 to vector<1x256xf32>
      %65 = arith.select %63, %48, %64 : vector<1x256xi1>, vector<1x256xf32>
      %c0_i32_22 = arith.constant 0 : i32
      %c15_i32 = arith.constant 15 : i32
      %66 = vector.broadcast %c0_i32_22 : i32 to vector<1x256xi32>
      %67 = arith.maxsi %66, %50 : vector<1x256xi32>
      %68 = vector.broadcast %c15_i32 : i32 to vector<1x256xi32>
      %69 = arith.minsi %68, %67 : vector<1x256xi32>
      %c0_i32_23 = arith.constant 0 : i32
      %c15_i32_24 = arith.constant 15 : i32
      %70 = vector.broadcast %c0_i32_23 : i32 to vector<1x256xi32>
      %71 = arith.maxsi %70, %52 : vector<1x256xi32>
      %72 = vector.broadcast %c15_i32_24 : i32 to vector<1x256xi32>
      %73 = arith.minsi %72, %71 : vector<1x256xi32>
      %c16_i32_25 = arith.constant 16 : i32
      %74 = vector.broadcast %c16_i32_25 : i32 to vector<1x256xi32>
      %75 = arith.muli %73, %74 : vector<1x256xi32>
      %76 = arith.addi %75, %69 : vector<1x256xi32>
      %77 = vector.broadcast %17 : i32 to vector<1x256xi32>
      %78 = arith.subi %76, %77 : vector<1x256xi32>
      %cst_26 = arith.constant 1.000000e+00 : f32
      %79 = vector.broadcast %cst_26 : f32 to vector<1x256xf32>
      %80 = arith.subf %79, %25 : vector<1x256xf32>
      %81 = arith.mulf %24, %80 : vector<1x256xf32>
      %c1_i32_27 = arith.constant 1 : i32
      %82 = vector.broadcast %c1_i32_27 : i32 to vector<1x256xi32>
      %83 = arith.addi %34, %82 : vector<1x256xi32>
      %c0_i32_28 = arith.constant 0 : i32
      %84 = vector.broadcast %c0_i32_28 : i32 to vector<1x256xi32>
      %85 = arith.addi %43, %84 : vector<1x256xi32>
      %c0_i32_29 = arith.constant 0 : i32
      %86 = vector.broadcast %c0_i32_29 : i32 to vector<1x256xi32>
      %87 = arith.cmpi sge, %83, %86 : vector<1x256xi32>
      %c16_i32_30 = arith.constant 16 : i32
      %88 = vector.broadcast %c16_i32_30 : i32 to vector<1x256xi32>
      %89 = arith.cmpi slt, %83, %88 : vector<1x256xi32>
      %90 = arith.andi %87, %89 : vector<1x256xi1>
      %c0_i32_31 = arith.constant 0 : i32
      %91 = vector.broadcast %c0_i32_31 : i32 to vector<1x256xi32>
      %92 = arith.cmpi sge, %85, %91 : vector<1x256xi32>
      %93 = arith.andi %90, %92 : vector<1x256xi1>
      %c16_i32_32 = arith.constant 16 : i32
      %94 = vector.broadcast %c16_i32_32 : i32 to vector<1x256xi32>
      %95 = arith.cmpi slt, %85, %94 : vector<1x256xi32>
      %96 = arith.andi %93, %95 : vector<1x256xi1>
      %cst_33 = arith.constant 0.000000e+00 : f32
      %97 = vector.broadcast %cst_33 : f32 to vector<1x256xf32>
      %98 = arith.select %96, %81, %97 : vector<1x256xi1>, vector<1x256xf32>
      %c0_i32_34 = arith.constant 0 : i32
      %c15_i32_35 = arith.constant 15 : i32
      %99 = vector.broadcast %c0_i32_34 : i32 to vector<1x256xi32>
      %100 = arith.maxsi %99, %83 : vector<1x256xi32>
      %101 = vector.broadcast %c15_i32_35 : i32 to vector<1x256xi32>
      %102 = arith.minsi %101, %100 : vector<1x256xi32>
      %c0_i32_36 = arith.constant 0 : i32
      %c15_i32_37 = arith.constant 15 : i32
      %103 = vector.broadcast %c0_i32_36 : i32 to vector<1x256xi32>
      %104 = arith.maxsi %103, %85 : vector<1x256xi32>
      %105 = vector.broadcast %c15_i32_37 : i32 to vector<1x256xi32>
      %106 = arith.minsi %105, %104 : vector<1x256xi32>
      %c16_i32_38 = arith.constant 16 : i32
      %107 = vector.broadcast %c16_i32_38 : i32 to vector<1x256xi32>
      %108 = arith.muli %106, %107 : vector<1x256xi32>
      %109 = arith.addi %108, %102 : vector<1x256xi32>
      %110 = vector.broadcast %17 : i32 to vector<1x256xi32>
      %111 = arith.subi %109, %110 : vector<1x256xi32>
      %cst_39 = arith.constant 1.000000e+00 : f32
      %112 = vector.broadcast %cst_39 : f32 to vector<1x256xf32>
      %113 = arith.subf %112, %24 : vector<1x256xf32>
      %114 = arith.mulf %113, %25 : vector<1x256xf32>
      %c0_i32_40 = arith.constant 0 : i32
      %115 = vector.broadcast %c0_i32_40 : i32 to vector<1x256xi32>
      %116 = arith.addi %34, %115 : vector<1x256xi32>
      %c1_i32_41 = arith.constant 1 : i32
      %117 = vector.broadcast %c1_i32_41 : i32 to vector<1x256xi32>
      %118 = arith.addi %43, %117 : vector<1x256xi32>
      %c0_i32_42 = arith.constant 0 : i32
      %119 = vector.broadcast %c0_i32_42 : i32 to vector<1x256xi32>
      %120 = arith.cmpi sge, %116, %119 : vector<1x256xi32>
      %c16_i32_43 = arith.constant 16 : i32
      %121 = vector.broadcast %c16_i32_43 : i32 to vector<1x256xi32>
      %122 = arith.cmpi slt, %116, %121 : vector<1x256xi32>
      %123 = arith.andi %120, %122 : vector<1x256xi1>
      %c0_i32_44 = arith.constant 0 : i32
      %124 = vector.broadcast %c0_i32_44 : i32 to vector<1x256xi32>
      %125 = arith.cmpi sge, %118, %124 : vector<1x256xi32>
      %126 = arith.andi %123, %125 : vector<1x256xi1>
      %c16_i32_45 = arith.constant 16 : i32
      %127 = vector.broadcast %c16_i32_45 : i32 to vector<1x256xi32>
      %128 = arith.cmpi slt, %118, %127 : vector<1x256xi32>
      %129 = arith.andi %126, %128 : vector<1x256xi1>
      %cst_46 = arith.constant 0.000000e+00 : f32
      %130 = vector.broadcast %cst_46 : f32 to vector<1x256xf32>
      %131 = arith.select %129, %114, %130 : vector<1x256xi1>, vector<1x256xf32>
      %c0_i32_47 = arith.constant 0 : i32
      %c15_i32_48 = arith.constant 15 : i32
      %132 = vector.broadcast %c0_i32_47 : i32 to vector<1x256xi32>
      %133 = arith.maxsi %132, %116 : vector<1x256xi32>
      %134 = vector.broadcast %c15_i32_48 : i32 to vector<1x256xi32>
      %135 = arith.minsi %134, %133 : vector<1x256xi32>
      %c0_i32_49 = arith.constant 0 : i32
      %c15_i32_50 = arith.constant 15 : i32
      %136 = vector.broadcast %c0_i32_49 : i32 to vector<1x256xi32>
      %137 = arith.maxsi %136, %118 : vector<1x256xi32>
      %138 = vector.broadcast %c15_i32_50 : i32 to vector<1x256xi32>
      %139 = arith.minsi %138, %137 : vector<1x256xi32>
      %c16_i32_51 = arith.constant 16 : i32
      %140 = vector.broadcast %c16_i32_51 : i32 to vector<1x256xi32>
      %141 = arith.muli %139, %140 : vector<1x256xi32>
      %142 = arith.addi %141, %135 : vector<1x256xi32>
      %143 = vector.broadcast %17 : i32 to vector<1x256xi32>
      %144 = arith.subi %142, %143 : vector<1x256xi32>
      %145 = arith.mulf %24, %25 : vector<1x256xf32>
      %c1_i32_52 = arith.constant 1 : i32
      %146 = vector.broadcast %c1_i32_52 : i32 to vector<1x256xi32>
      %147 = arith.addi %34, %146 : vector<1x256xi32>
      %c1_i32_53 = arith.constant 1 : i32
      %148 = vector.broadcast %c1_i32_53 : i32 to vector<1x256xi32>
      %149 = arith.addi %43, %148 : vector<1x256xi32>
      %c0_i32_54 = arith.constant 0 : i32
      %150 = vector.broadcast %c0_i32_54 : i32 to vector<1x256xi32>
      %151 = arith.cmpi sge, %147, %150 : vector<1x256xi32>
      %c16_i32_55 = arith.constant 16 : i32
      %152 = vector.broadcast %c16_i32_55 : i32 to vector<1x256xi32>
      %153 = arith.cmpi slt, %147, %152 : vector<1x256xi32>
      %154 = arith.andi %151, %153 : vector<1x256xi1>
      %c0_i32_56 = arith.constant 0 : i32
      %155 = vector.broadcast %c0_i32_56 : i32 to vector<1x256xi32>
      %156 = arith.cmpi sge, %149, %155 : vector<1x256xi32>
      %157 = arith.andi %154, %156 : vector<1x256xi1>
      %c16_i32_57 = arith.constant 16 : i32
      %158 = vector.broadcast %c16_i32_57 : i32 to vector<1x256xi32>
      %159 = arith.cmpi slt, %149, %158 : vector<1x256xi32>
      %160 = arith.andi %157, %159 : vector<1x256xi1>
      %cst_58 = arith.constant 0.000000e+00 : f32
      %161 = vector.broadcast %cst_58 : f32 to vector<1x256xf32>
      %162 = arith.select %160, %145, %161 : vector<1x256xi1>, vector<1x256xf32>
      %c0_i32_59 = arith.constant 0 : i32
      %c15_i32_60 = arith.constant 15 : i32
      %163 = vector.broadcast %c0_i32_59 : i32 to vector<1x256xi32>
      %164 = arith.maxsi %163, %147 : vector<1x256xi32>
      %165 = vector.broadcast %c15_i32_60 : i32 to vector<1x256xi32>
      %166 = arith.minsi %165, %164 : vector<1x256xi32>
      %c0_i32_61 = arith.constant 0 : i32
      %c15_i32_62 = arith.constant 15 : i32
      %167 = vector.broadcast %c0_i32_61 : i32 to vector<1x256xi32>
      %168 = arith.maxsi %167, %149 : vector<1x256xi32>
      %169 = vector.broadcast %c15_i32_62 : i32 to vector<1x256xi32>
      %170 = arith.minsi %169, %168 : vector<1x256xi32>
      %c16_i32_63 = arith.constant 16 : i32
      %171 = vector.broadcast %c16_i32_63 : i32 to vector<1x256xi32>
      %172 = arith.muli %170, %171 : vector<1x256xi32>
      %173 = arith.addi %172, %166 : vector<1x256xi32>
      %174 = vector.broadcast %17 : i32 to vector<1x256xi32>
      %175 = arith.subi %173, %174 : vector<1x256xi32>
      %176 = tpu.iota {dimensions = array<i32: 0>} : vector<128x256xi32>
      %c0_i32_64 = arith.constant 0 : i32
      %177 = vector.broadcast %c0_i32_64 : i32 to vector<1x256xi32>
      %178 = arith.subi %78, %177 : vector<1x256xi32>
      %179 = vector.broadcast %178 : vector<1x256xi32> to vector<128x256xi32>
      %180 = arith.cmpi eq, %176, %179 : vector<128x256xi32>
      %cst_65 = arith.constant 0.000000e+00 : f32
      %181 = vector.broadcast %cst_65 : f32 to vector<1x256xf32>
      %182 = vector.shape_cast %65 : vector<1x256xf32> to vector<1x256xf32>
      %183 = vector.broadcast %182 : vector<1x256xf32> to vector<128x256xf32>
      %184 = vector.shape_cast %181 : vector<1x256xf32> to vector<1x256xf32>
      %185 = vector.broadcast %184 : vector<1x256xf32> to vector<128x256xf32>
      %186 = arith.select %180, %183, %185 : vector<128x256xi1>, vector<128x256xf32>
      %c0_i32_66 = arith.constant 0 : i32
      %187 = vector.broadcast %c0_i32_66 : i32 to vector<1x256xi32>
      %188 = arith.subi %111, %187 : vector<1x256xi32>
      %189 = vector.broadcast %188 : vector<1x256xi32> to vector<128x256xi32>
      %190 = arith.cmpi eq, %176, %189 : vector<128x256xi32>
      %cst_67 = arith.constant 0.000000e+00 : f32
      %191 = vector.broadcast %cst_67 : f32 to vector<1x256xf32>
      %192 = vector.shape_cast %98 : vector<1x256xf32> to vector<1x256xf32>
      %193 = vector.broadcast %192 : vector<1x256xf32> to vector<128x256xf32>
      %194 = vector.shape_cast %191 : vector<1x256xf32> to vector<1x256xf32>
      %195 = vector.broadcast %194 : vector<1x256xf32> to vector<128x256xf32>
      %196 = arith.select %190, %193, %195 : vector<128x256xi1>, vector<128x256xf32>
      %197 = arith.addf %186, %196 : vector<128x256xf32>
      %c0_i32_68 = arith.constant 0 : i32
      %198 = vector.broadcast %c0_i32_68 : i32 to vector<1x256xi32>
      %199 = arith.subi %144, %198 : vector<1x256xi32>
      %200 = vector.broadcast %199 : vector<1x256xi32> to vector<128x256xi32>
      %201 = arith.cmpi eq, %176, %200 : vector<128x256xi32>
      %cst_69 = arith.constant 0.000000e+00 : f32
      %202 = vector.broadcast %cst_69 : f32 to vector<1x256xf32>
      %203 = vector.shape_cast %131 : vector<1x256xf32> to vector<1x256xf32>
      %204 = vector.broadcast %203 : vector<1x256xf32> to vector<128x256xf32>
      %205 = vector.shape_cast %202 : vector<1x256xf32> to vector<1x256xf32>
      %206 = vector.broadcast %205 : vector<1x256xf32> to vector<128x256xf32>
      %207 = arith.select %201, %204, %206 : vector<128x256xi1>, vector<128x256xf32>
      %208 = arith.addf %197, %207 : vector<128x256xf32>
      %c0_i32_70 = arith.constant 0 : i32
      %209 = vector.broadcast %c0_i32_70 : i32 to vector<1x256xi32>
      %210 = arith.subi %175, %209 : vector<1x256xi32>
      %211 = vector.broadcast %210 : vector<1x256xi32> to vector<128x256xi32>
      %212 = arith.cmpi eq, %176, %211 : vector<128x256xi32>
      %cst_71 = arith.constant 0.000000e+00 : f32
      %213 = vector.broadcast %cst_71 : f32 to vector<1x256xf32>
      %214 = vector.shape_cast %162 : vector<1x256xf32> to vector<1x256xf32>
      %215 = vector.broadcast %214 : vector<1x256xf32> to vector<128x256xf32>
      %216 = vector.shape_cast %213 : vector<1x256xf32> to vector<1x256xf32>
      %217 = vector.broadcast %216 : vector<1x256xf32> to vector<128x256xf32>
      %218 = arith.select %212, %215, %217 : vector<128x256xi1>, vector<128x256xf32>
      %219 = arith.addf %208, %218 : vector<128x256xf32>
      %c0_72 = arith.constant 0 : index
      %c0_73 = arith.constant 0 : index
      %c0_74 = arith.constant 0 : index
      %220 = vector.load %arg5[%c0_72, %c0_73, %c0_74] : memref<1x8x256xf32, #tpu.memory_space<vmem>>, vector<1x8x128xf32>
      %221 = vector.shape_cast %220 : vector<1x8x128xf32> to vector<8x128xf32>
      %c0_75 = arith.constant 0 : index
      %c0_76 = arith.constant 0 : index
      %222 = vector.load %arg8[%c0_75, %c0_76] : memref<8x256xf32, #tpu.memory_space<vmem>>, vector<8x256xf32>
      %cst_77 = arith.constant dense<0.000000e+00> : vector<8x256xf32>
      %223 = tpu.matmul %221, %219, %cst_77 {dimension_numbers = #tpu.dot_dimension_numbers<[1], [0], [0], [1], [0, 0, 1, 1], [], []>} : vector<8x128xf32>, vector<128x256xf32>, vector<8x256xf32> -> vector<8x256xf32>
      %224 = arith.addf %222, %223 : vector<8x256xf32>
      %c0_78 = arith.constant 0 : index
      %c0_79 = arith.constant 0 : index
      %225 = vector.load %arg8[%c0_78, %c0_79] : memref<8x256xf32, #tpu.memory_space<vmem>>, vector<8x256xf32>
      tpu.vector_store %arg8[%c0_78, %c0_79], %224 {strides = array<i32>} : memref<8x256xf32, #tpu.memory_space<vmem>>, vector<8x256xf32>,
      %c128_i32 = arith.constant 128 : i32
      %226 = vector.broadcast %c128_i32 : i32 to vector<1x256xi32>
      %227 = arith.subi %78, %226 : vector<1x256xi32>
      %228 = vector.broadcast %227 : vector<1x256xi32> to vector<128x256xi32>
      %229 = arith.cmpi eq, %176, %228 : vector<128x256xi32>
      %cst_80 = arith.constant 0.000000e+00 : f32
      %230 = vector.broadcast %cst_80 : f32 to vector<1x256xf32>
      %231 = vector.shape_cast %65 : vector<1x256xf32> to vector<1x256xf32>
      %232 = vector.broadcast %231 : vector<1x256xf32> to vector<128x256xf32>
      %233 = vector.shape_cast %230 : vector<1x256xf32> to vector<1x256xf32>
      %234 = vector.broadcast %233 : vector<1x256xf32> to vector<128x256xf32>
      %235 = arith.select %229, %232, %234 : vector<128x256xi1>, vector<128x256xf32>
      %c128_i32_81 = arith.constant 128 : i32
      %236 = vector.broadcast %c128_i32_81 : i32 to vector<1x256xi32>
      %237 = arith.subi %111, %236 : vector<1x256xi32>
      %238 = vector.broadcast %237 : vector<1x256xi32> to vector<128x256xi32>
      %239 = arith.cmpi eq, %176, %238 : vector<128x256xi32>
      %cst_82 = arith.constant 0.000000e+00 : f32
      %240 = vector.broadcast %cst_82 : f32 to vector<1x256xf32>
      %241 = vector.shape_cast %98 : vector<1x256xf32> to vector<1x256xf32>
      %242 = vector.broadcast %241 : vector<1x256xf32> to vector<128x256xf32>
      %243 = vector.shape_cast %240 : vector<1x256xf32> to vector<1x256xf32>
      %244 = vector.broadcast %243 : vector<1x256xf32> to vector<128x256xf32>
      %245 = arith.select %239, %242, %244 : vector<128x256xi1>, vector<128x256xf32>
      %246 = arith.addf %235, %245 : vector<128x256xf32>
      %c128_i32_83 = arith.constant 128 : i32
      %247 = vector.broadcast %c128_i32_83 : i32 to vector<1x256xi32>
      %248 = arith.subi %144, %247 : vector<1x256xi32>
      %249 = vector.broadcast %248 : vector<1x256xi32> to vector<128x256xi32>
      %250 = arith.cmpi eq, %176, %249 : vector<128x256xi32>
      %cst_84 = arith.constant 0.000000e+00 : f32
      %251 = vector.broadcast %cst_84 : f32 to vector<1x256xf32>
      %252 = vector.shape_cast %131 : vector<1x256xf32> to vector<1x256xf32>
      %253 = vector.broadcast %252 : vector<1x256xf32> to vector<128x256xf32>
      %254 = vector.shape_cast %251 : vector<1x256xf32> to vector<1x256xf32>
      %255 = vector.broadcast %254 : vector<1x256xf32> to vector<128x256xf32>
      %256 = arith.select %250, %253, %255 : vector<128x256xi1>, vector<128x256xf32>
      %257 = arith.addf %246, %256 : vector<128x256xf32>
      %c128_i32_85 = arith.constant 128 : i32
      %258 = vector.broadcast %c128_i32_85 : i32 to vector<1x256xi32>
      %259 = arith.subi %175, %258 : vector<1x256xi32>
      %260 = vector.broadcast %259 : vector<1x256xi32> to vector<128x256xi32>
      %261 = arith.cmpi eq, %176, %260 : vector<128x256xi32>
      %cst_86 = arith.constant 0.000000e+00 : f32
      %262 = vector.broadcast %cst_86 : f32 to vector<1x256xf32>
      %263 = vector.shape_cast %162 : vector<1x256xf32> to vector<1x256xf32>
      %264 = vector.broadcast %263 : vector<1x256xf32> to vector<128x256xf32>
      %265 = vector.shape_cast %262 : vector<1x256xf32> to vector<1x256xf32>
      %266 = vector.broadcast %265 : vector<1x256xf32> to vector<128x256xf32>
      %267 = arith.select %261, %264, %266 : vector<128x256xi1>, vector<128x256xf32>
      %268 = arith.addf %257, %267 : vector<128x256xf32>
      %c0_87 = arith.constant 0 : index
      %c0_88 = arith.constant 0 : index
      %c128 = arith.constant 128 : index
      %269 = vector.load %arg5[%c0_87, %c0_88, %c128] : memref<1x8x256xf32, #tpu.memory_space<vmem>>, vector<1x8x128xf32>
      %270 = vector.shape_cast %269 : vector<1x8x128xf32> to vector<8x128xf32>
      %c0_89 = arith.constant 0 : index
      %c0_90 = arith.constant 0 : index
      %271 = vector.load %arg8[%c0_89, %c0_90] : memref<8x256xf32, #tpu.memory_space<vmem>>, vector<8x256xf32>
      %cst_91 = arith.constant dense<0.000000e+00> : vector<8x256xf32>
      %272 = tpu.matmul %270, %268, %cst_91 {dimension_numbers = #tpu.dot_dimension_numbers<[1], [0], [0], [1], [0, 0, 1, 1], [], []>} : vector<8x128xf32>, vector<128x256xf32>, vector<8x256xf32> -> vector<8x256xf32>
      %273 = arith.addf %271, %272 : vector<8x256xf32>
      %c0_92 = arith.constant 0 : index
      %c0_93 = arith.constant 0 : index
      %274 = vector.load %arg8[%c0_92, %c0_93] : memref<8x256xf32, #tpu.memory_space<vmem>>, vector<8x256xf32>
      tpu.vector_store %arg8[%c0_92, %c0_93], %273 {strides = array<i32>} : memref<8x256xf32, #tpu.memory_space<vmem>>, vector<8x256xf32>,
    } else {
    }
    %c0_i32_2 = arith.constant 0 : i32
    %13 = arith.cmpi eq, %arg2, %c0_i32_2 : i32
    %14 = arith.extui %13 : i1 to i32
    %c0_i32_3 = arith.constant 0 : i32
    %15 = arith.cmpi ne, %14, %c0_i32_3 : i32
    scf.if %15 {
      %c0 = arith.constant 0 : index
      %c0_4 = arith.constant 0 : index
      %16 = vector.load %arg8[%c0, %c0_4] : memref<8x256xf32, #tpu.memory_space<vmem>>, vector<8x256xf32>
      %c0_5 = arith.constant 0 : index
      %c0_6 = arith.constant 0 : index
      %c0_7 = arith.constant 0 : index
      %17 = vector.load %arg7[%c0_5, %c0_6, %c0_7] : memref<1x8x256xf32, #tpu.memory_space<vmem>>, vector<1x8x256xf32>
      %18 = vector.shape_cast %17 : vector<1x8x256xf32> to vector<8x256xf32>
      %19 = vector.shape_cast %16 : vector<8x256xf32> to vector<1x8x256xf32>
      tpu.vector_store %arg7[%c0_5, %c0_6, %c0_7], %19 {strides = array<i32>} : memref<1x8x256xf32, #tpu.memory_space<vmem>>, vector<1x8x256xf32>,
    } else {
    }
    return
  }
  func.func @transform_0(%arg0: i32, %arg1: i32, %arg2: i32, %arg3: memref<2xi32, #tpu.memory_space<smem>>, %arg4: memref<2xi32, #tpu.memory_space<smem>>) -> (i32, i32, i32) {
    %c1_i32 = arith.constant 1 : i32
    %0 = arith.muli %arg0, %c1_i32 : i32
    %1 = arith.addi %0, %arg1 : i32
    %2 = arith.index_cast %1 : i32 to index
    %3 = memref.load %arg3[%2] : memref<2xi32, #tpu.memory_space<smem>>
    %4 = arith.index_cast %1 : i32 to index
    %5 = memref.load %arg4[%4] : memref<2xi32, #tpu.memory_space<smem>>
    %6 = arith.maxsi %5, %3 : i32
    %7 = arith.addi %3, %arg2 : i32
    %8 = arith.minsi %7, %6 : i32
    %c0_i32 = arith.constant 0 : i32
    %c0_i32_0 = arith.constant 0 : i32
    return %arg0, %c0_i32, %8 : i32, i32, i32
  }
  func.func @transform_1(%arg0: i32, %arg1: i32, %arg2: i32, %arg3: memref<2xi32, #tpu.memory_space<smem>>, %arg4: memref<2xi32, #tpu.memory_space<smem>>) -> (i32, i32, i32) {
    %c0_i32 = arith.constant 0 : i32
    %c0_i32_0 = arith.constant 0 : i32
    return %arg0, %c0_i32, %arg1 : i32, i32, i32
  }
  func.func @transform_2(%arg0: i32, %arg1: i32, %arg2: i32, %arg3: memref<2xi32, #tpu.memory_space<smem>>, %arg4: memref<2xi32, #tpu.memory_space<smem>>) -> (i32, i32, i32) {
    %c0_i32 = arith.constant 0 : i32
    %c0_i32_0 = arith.constant 0 : i32
    return %arg0, %c0_i32, %arg1 : i32, i32, i32
  }
}

</mosaic_0001>

<bundles_post_ra>
// kernel: tpu_custom_call.1
= control target key start
LH: loop header
LB: loop body
LE: loop exit
PB: predicated region body
PF: predicated region fallthrough
CT: control target
= control target key end

     0   :  { %s1817_s15 = smov [#allocation4]   ;;  %s3089_s0 = inlined_call_operand.hbm [shape: s32[2], index: 0, kind: input, shape index: {}]   ;;  %s3090_s2 = inlined_call_operand.hbm [shape: f32[2,8,256], index: 2, kind: input, shape index: {}]   ;;  %s3091_s3 = inlined_call_operand.hbm [shape: f32[2,2,256], index: 3, kind: input, shape index: {}]   ;;  %s3092_s4 = inlined_call_operand.hbm [shape: f32[2,8,256], index: 4, kind: output, shape index: {}]   ;;  %s3093_s1 = inlined_call_operand.vmem [shape: s32[2], index: 1, kind: input, shape index: {}]  }
   0x1   :  { %3107 = sst [smem:[#allocation27_spill]] %s3092_s4  ;;  %s11_s20 = sshll.u32 %s3093_s1, 4  ;;  %s12_s20 = int_to_ptr.vmem [resolvable:$true] %s11_s20 }
   0x2   :  { %10 = dma.hbm_to_smem %s3089_s0, 16, %s1817_s15, [#allocation3] }
   0x3   :  { %s1637_s21 = scalar_lea.vmem %s12_s20, 16  ;;  %p1642_p1 = scmp.lt.s32.totalorder %s12_s20, %s12_s20 }
   0x4   :  { %p1638_p0 = scmp.ne.s32.totalorder %s12_s20, %s1637_s21  ;;  %p1643_p2 = scmp.lt.s32.totalorder %s1637_s21, %s1637_s21 }
   0x6   :  { %p1644_p3 = por %p1643_p2, %p1642_p1 }
   0x8   :  { %p1645_p4 = pnand %p1644_p3, %p1638_p0 }
   0xa   :  { %1648 = shalt.err (!%p1645_p4)  }
   0xb   :  { %s1818_s22 = smov [#allocation5]  }
   0xc   :  { %14 = dma.vmem_to_smem %s12_s20, 16, %s1818_s22, [#allocation3] }
   0xd   :  { %1767 = dma.done.wait [#allocation3], 32 }
   0xe   :  { %1768 = vsyncadd [#allocation3], 4294967264 }
   0xf   :  { %16 = sfence }
  0x10   :  { %17 = vsyncpa [#allocation7], 0 }
  0x11   :  { %19 = vsyncpa [#allocation7 + $0x1], 0 }
  0x12   :  { %20 = vsyncpa [#allocation10], 0 }
  0x13   :  { %22 = vsyncpa [#allocation10 + $0x1], 0 }
  0x14   :  { %23 = vsyncpa [#allocation8], 0 }
  0x15   :  { %25 = vsyncpa [#allocation8 + $0x1], 0  ;;  %s1855_s0 = smov 0   ;;  %s1857_s1 = smov 0  }
  0x16   :  { %s1859_s23 = smov 0   ;;  %s1861_s24 = smov 0  }
  0x17   :  { %s1863_s25 = smov 0   ;;  %s1865_s26 = smov 0  }
  0x18   :  { %s1867_s27 = smov 0   ;;  %s1869_s28 = smov 0  }
  0x19   :  { %s1871_s29 = smov 0  }
  0x1a LB: > { %3108 = sst [smem:[#allocation20_spill]] %s1783_s0  ;;  %s1492_s30 = sadd.s32 4294967295, %s1815_s29   ;;  %s1815_s29 = sphi %s1871_s29, %s31_s29   ;;  %s1811_s28 = sphi %s1869_s28, %s3147_s28   ;;  %s1807_s27 = sphi %s1867_s27, %s3146_s27   ;;  %s1803_s26 = sphi %s1865_s26, %s3153_s26   ;;  %s1799_s25 = sphi %s1863_s25, %s3152_s25   ;;  %s1795_s24 = sphi %s1861_s24, %s3151_s24   ;;  %s1791_s23 = sphi %s1859_s23, %s3150_s23   ;;  %s1787_s1 = sphi %s1857_s1, %s3149_s1   ;;  %s1783_s0 = sphi %s1855_s0, %s3148_s0  }
  0x1b   : > { %3109 = sst [smem:[#allocation21_spill]] %s1811_s28  ;;  %s50_s5 = sadd.s32 1, %s1811_s28 }
  0x1c   : > { %p52_p5 = scmp.ge.s32.totalorder %s50_s5, 2  ;;  %s55_s6 = sld [smem:[#allocation4 + %s1811_s28]] }
  0x1d   : > { %s56_s7 = sld [smem:[#allocation5 + %s1811_s28]]  ;;  %s75_s8 = sadd.s32 1, %s1803_s26 }
  0x1e   : > { %s3155_s5 = smov (%p52_p5, %s50_s5), 0  ;;  %p82_p6 = scmp.ne.s32.totalorder %s1803_s26, %s1799_s25 }
  0x1f   : > { %3110 = sst [smem:[#allocation22_spill]] %s3155_s5  ;;  %p83_p7 = scmp.eq.s32.totalorder %s1815_s29, 0 }
  0x20   : > { %s63_s9 = sld [smem:[#allocation4 + %s3155_s5]]  ;;  %s1911_s10 = ssub.s32 %s1811_s28, %s3155_s5 }
  0x21   : > { %s64_s11 = sld [smem:[#allocation5 + %s3155_s5]]  ;;  %p1916_p8 = por %p83_p7, %p82_p6 }
  0x22   : > { %p88_p9 = scmp.ne.s32.totalorder %s1799_s25, %s1795_s24  ;;  %p1923_p10 = scmp.eq.s32.totalorder %s1492_s30, 0 }
  0x23   : > { %p57_p11 = scmp.gt.s32.totalorder %s56_s7, %s55_s6  ;;  %p3094_p0 = scmp.lt.s32.totalorder %s1815_s29, 2 }
  0x24   : > { %p1930_p13 = por %p1923_p10, %p88_p9  ;;  %s3095_s15 = sand.u32 1, %s1803_s26  }
  0x25   : > { %s3157_s7 = smov (!%p57_p11, %s56_s7), %s55_s6  ;;  %s1498_s16 = sshll.u32 %s1811_s28, 1 }
  0x26   : > { %s3113_s14 = scalar_select %p1930_p13, 1, 0 }
  0x27   : > { %p60_p1 = scmp.lt.s32.totalorder %s55_s6, %s3157_s7  ;;  %p65_p2 = scmp.gt.s32.totalorder %s64_s11, %s63_s9 }
  0x28   : > { %s1496_s17 = sshll.u32 %s3095_s15, 4  ;;  %p1943_p3 = pnand %p3094_p0, %p1916_p8 }
  0x29   : > { %s3159_s6 = smov (!%p60_p1, %s55_s6), %s3157_s7  ;;  %s3161_s11 = smov (!%p65_p2, %s64_s11), %s63_s9 }
  0x2a   : > { %p68_p4 = scmp.lt.s32.totalorder %s63_s9, %s3161_s11  ;;  %s172_s19 = scalar_lea.vmem [#allocation6], %s1496_s17 }
  0x2b   : > { %s190_s20 = sshll.u32 %s172_s19, 4  ;;  %p1503_p6 = scmp.ge.s32.totalorder %s1815_s29, 1  ;;  %s1952_s20 = int_to_ptr.vmem [resolvable:$true] %s190_s20 }
  0x2c   : > { %s1526_s21 = scalar_select %p1916_p8, [#allocation4], [#allocation12] }
  0x2d   : > { %s3163_s9 = smov (!%p68_p4, %s63_s9), %s3161_s11  ;;  %p216_p9 = scmp.lt.s32.totalorder %s1815_s29, 3 }
  0x2e   : > { %s1527_s22 = scalar_select %p1916_p8, %s1811_s28, 0 }
  0x2f   : > { %s71_s24 = ssub.s32 %s3159_s6, %s3163_s9  ;;  %s3165_s21 = smov (!%p3094_p0, %s1526_s21), [#allocation14] }
  0x30   : > { %s72_s7 = sor.u32 %s71_s24, %s1911_s10  ;;  %s3167_s22 = smov (!%p3094_p0, %s1527_s22), 0 }
  0x31   : > { %p73_p5 = scmp.eq.s32.totalorder %s72_s7, 0  ;;  %s174_s9 = sld [smem:[%s3165_s21 + %s3167_s22]] }
  0x32   : > { %s1528_s6 = scalar_select %p1916_p8, [#allocation5], [#allocation13] }
  0x33   : > { %s1961_s11 = scalar_select %p73_p5, %s1803_s26, %s75_s8  }
  0x34   : > { %s3169_s6 = smov (!%p3094_p0, %s1528_s6), [#allocation15]  ;;  %p1970_p11 = pnand %p1503_p6, %p216_p9 }
  0x35   : > { %3115 = sst [smem:[#allocation23_spill]] %s1961_s11  ;;  %s1493_s24 = sadd.s32 4294967294, %s1815_s29  }
  0x36   : > { %s3116_s17 = scalar_select %p1970_p11, 1, 0 }
  0x37   : > { %s175_s19 = sld [smem:[%s3169_s6 + %s3167_s22]]  ;;  %p101_p1 = scmp.eq.s32.totalorder %s1911_s10, 0 }
  0x38   : > { %s103_s8 = sadd.s32 1, %s1791_s23  ;;  %p110_p2 = scmp.ne.s32.totalorder %s1791_s23, %s1787_s1 }
  0x39   : > { %s1980_s7 = scalar_select %p101_p1, %s1791_s23, %s103_s8  }
  0x3a   : > { %p1984_p4 = por %p110_p2, %p83_p7  ;;  %p116_p5 = scmp.ne.s32.totalorder %s1787_s1, %s1783_s0 }
  0x3b   : > { %3117 = sst [smem:[#allocation24_spill]] %s1980_s7  ;;  %p142_p6 = scmp.eq.s32.totalorder %s1492_s30, 1 }
  0x3c   : > { %s3118_s12 = scalar_select %p1984_p4, 1, 0 }
  0x3d   : > { %p176_p8 = scmp.gt.s32.totalorder %s175_s19, %s174_s9  ;;  %p1994_p9 = por %p116_p5, %p1923_p10 }
  0x3e   : > { %p1998_p12 = por %p142_p6, %p110_p2  ;;  %p148_p0 = scmp.eq.s32.totalorder %s1493_s24, 1 }
  0x3f   : > { %s3171_s19 = smov (!%p176_p8, %s175_s19), %s174_s9  ;;  %s3102_s22 = sand.u32 1, %s1791_s23  }
  0x40   : > { %s3119_s21 = scalar_select %p1994_p9, 1, 0 }
  0x41   : > { %s3120_s10 = scalar_select %p1998_p12, 1, 0 }
  0x42   : > { %p179_p1 = scmp.lt.s32.totalorder %s174_s9, %s3171_s19  ;;  %s1520_s6 = sshll.u32 %s1811_s28, 6 }
  0x43   : > { %3121 = sst [smem:[#allocation25_spill]] %s3120_s10  ;;  %p2004_p7 = por %p148_p0, %p116_p5 }
  0x44   : > { %s3173_s9 = smov (!%p179_p1, %s174_s9), %s3171_s19  ;;  %s1500_s13 = sshll.u32 %s3102_s22, 2 }
  0x45   : > { %s3122_s8 = scalar_select %p2004_p7, 1, 0 }
  0x46   : > { %s1497_s30 = sshll.u32 %s3173_s9, 1  ;;  %s2015_s0 = scalar_lea.hbm %s3091_s3, %s1520_s6 }
  0x47   : > { %3123 = sst [smem:[#allocation26_spill]] %s3122_s8  ;;  %s186_s15 = sadd.s32 %s1498_s16, %s1497_s30 }
  0x48   : > { %s1499_s5 = sshll.u32 %s186_s15, 7  ;;  %s201_s19 = scalar_lea.vmem [#allocation9], %s1500_s13 }
  0x49   : > { %s2020_s10 = scalar_lea.hbm %s3090_s2, %s1499_s5  ;;  %s211_s9 = sshll.u32 %s201_s19, 4  ;;  %s212_s9 = int_to_ptr.vmem [resolvable:$true] %s211_s9 }
  0x4a   : > { %s3124_s8 = sand.u32 1, %s1803_s26   ;;  %s1649_s28 = scalar_lea.hbm %s2020_s10, 256 }
  0x4b   : > { %s169_s22 = scalar_lea.sflag [#allocation7], %s3124_s8  ;;  %p1650_p10 = scmp.ne.s32.totalorder %s2020_s10, %s1649_s28 }
  0x4c   : > { %p1651_p0 = pneg %p1943_p3  ;;  %s1654_s11 = scalar_lea.hbm %s3090_s2, 512 }
  0x4d   : > { %p1655_p5 = scmp.lt.s32.totalorder %s2020_s10, %s3090_s2  ;;  %p1656_p6 = scmp.lt.s32.totalorder %s1654_s11, %s1649_s28 }
  0x4e   : > { %p1652_p2 = pnand %p1651_p0, %p1650_p10 }
  0x4f   : > { %p1657_p1 = por %p1656_p6, %p1655_p5 }
  0x50   : > { %p1653_p8 = pneg %p1652_p2 }
  0x52   : > { %p1658_p7 = pnand %p1657_p1, %p1653_p8 }
  0x54   : > { %1661 = shalt.err (!%p1658_p7)
}
  0x55   : > { %s1662_s7 = scalar_lea.vmem %s1952_s20, 256  ;;  %s1819_s6 = smov [#allocation6]  }
  0x56   : > { %p1663_p12 = scmp.ne.s32.totalorder %s1952_s20, %s1662_s7  ;;  %s1667_s8 = sshll.u32 %s1819_s6, 4  ;;  %s1668_s8 = int_to_ptr.vmem [resolvable:$false] %s1667_s8 }
  0x57   : > { %s1669_s30 = scalar_lea.vmem %s1668_s8, 512  ;;  %p1670_p2 = scmp.lt.s32.totalorder %s1952_s20, %s1668_s8 }
  0x58   : > { %p1665_p9 = pnand %p1663_p12, %p1651_p0  ;;  %p1671_p13 = scmp.lt.s32.totalorder %s1669_s30, %s1662_s7 }
  0x5a   : > { %p1666_p10 = pneg %p1665_p9  ;;  %p1672_p11 = por %p1671_p13, %p1670_p2 }
  0x5c   : > { %p1673_p4 = pnand %p1672_p11, %p1666_p10 }
  0x5e   : > { %1676 = shalt.err (!%p1673_p4)
}
  0x5f   : > { %1543 = dma.hbm_to_vmem [thread:$0]  (!%p1943_p3), %s2020_s10, 256, %s1952_s20, %s169_s22  }
  0x60   : > { %p3125_p12 = scmp.ne.s32.totalorder %s3118_s12, 0  ;;  %p3126_p9 = scmp.lt.s32.totalorder %s1815_s29, 2 }
  0x61   : > { %s3128_s13 = sand.u32 1, %s1791_s23   ;;  %s1690_s19 = scalar_lea.vmem %s212_s9, 64 }
  0x62   : > { %p2046_p7 = pnand %p3126_p9, %p3125_p12  ;;  %s198_s24 = scalar_lea.sflag [#allocation10], %s3128_s13 }
  0x63   : > { %p1691_p11 = scmp.ne.s32.totalorder %s212_s9, %s1690_s19  ;;  %s1820_s18 = smov [#allocation9]  }
  0x64   : > { %p1679_p13 = pneg %p2046_p7  ;;  %s1695_s15 = sshll.u32 %s1820_s18, 4  ;;  %s1696_s15 = int_to_ptr.vmem [resolvable:$false] %s1695_s15 }
  0x65   : > { %s1697_s20 = scalar_lea.vmem %s1696_s15, 128  ;;  %p1698_p3 = scmp.lt.s32.totalorder %s212_s9, %s1696_s15 }
  0x66   : > { %p1693_p4 = pnand %p1691_p11, %p1679_p13  ;;  %p1699_p8 = scmp.lt.s32.totalorder %s1697_s20, %s1690_s19 }
  0x68   : > { %p1694_p0 = pneg %p1693_p4  ;;  %p1700_p5 = por %p1699_p8, %p1698_p3 }
  0x6a   : > { %p1701_p6 = pnand %p1700_p5, %p1694_p0 }
  0x6c   : > { %1704 = shalt.err (!%p1701_p6)
}
  0x6d   : > { %1546 = dma.hbm_to_vmem [thread:$0]  (!%p2046_p7), %s2015_s0, 64, %s212_s9, %s198_s24  }
  0x6e   : > { %p3129_p1 = scmp.ne.s32.totalorder %s3116_s17, 0 }
  0x6f   : > { %s222_s12 = sand.u32 (!%p3129_p1), 1, %s1799_s25   ;;  %p3130_p10 = scmp.ne.s32.totalorder (!%p3129_p1), %s3113_s14, 0 }
  0x70   : > { %220 = sbr.rel (%p3129_p1) target bundleno = 576 (0x240), region = 28  ;;  %s2060_s10 = sshll.u32 (!%p3129_p1), %s222_s12, 4 }
  0x71   : > { %s223_s22 = scalar_lea.sflag (!%p3129_p1), [#allocation7], %s222_s12  ;;  %s226_s16 = scalar_lea.vmem (!%p3129_p1), [#allocation6], %s2060_s10 }
  0x75   : > { %1770 = dma.done.wait (%p3130_p10), %s223_s22, 256  }
  0x76   : > { %1772 = vsyncadd (%p3130_p10), %s223_s22, 4294967040  ;;  %s2068_s11 = sand.u32 1, %s1787_s1   ;;  %p3131_p2 = scmp.ne.s32.totalorder %s3119_s21, 0 }
  0x77   : > { %s1505_s0 = sshll.u32 %s2068_s11, 2  ;;  %s232_s17 = scalar_lea.sflag [#allocation10], %s2068_s11 }
  0x78   : > { %s235_s9 = scalar_lea.vmem [#allocation9], %s1505_s0 }
  0x79   : > { %1774 = dma.done.wait (%p3131_p2), %s232_s17, 64  }
  0x7a   : > { %1776 = vsyncadd (%p3131_p2), %s232_s17, 4294967232  ;;  %s1506_s4 = sshll.u32 %s2068_s11, 4  ;;  %s279_s14 = sld [smem:[#allocation4 + %s1807_s27]]  ;;  %v1821_v0 = vmov 0.0  }
  0x7b   : > { %276 = vst [vmem:[#allocation2] sm:$0xff] %v1821_v0  ;;  %277 = vst [vmem:[#allocation2 + $0x8] sm:$0xff] %v1821_v0  ;;  %s280_s5 = sld [smem:[#allocation5 + %s1807_s27]]  ;;  %s2079_s6 = scalar_lea.vmem [#allocation11], %s1506_s4 }
  0x81   : > { %s281_s7 = ssub.s32 %s280_s5, %s279_s14 }
  0x82   : > { %p1508_p12 = scmp.lt.s32.totalorder %s281_s7, 0 }
  0x83   : > { %s1509_s21 = sshll.u32 (!%p1508_p12), %s279_s14, 8 }
  0x84   : > { %285 = sbr.rel (%p1508_p12) target bundleno = 550 (0x226), region = 44 }
  0x89   : > { %v288_v1 = vld [vmem:[%s235_s9] ss:$2 sm:$0x3]  ;;  %v1510_v2 = vld [vmem:[%s235_s9 + $0x1] ss:$2 sm:$0x3]  ;;  %v366_v4 = vlaneseq  ;;  %v2083_v18 = vstv %s1509_s21 }
  0x8a   : > { %v291_v3 = vfloor.f32 %v288_v1  ;;  %v292_v5 = vfloor.f32 %v1510_v2 }
  0x8b   : > { %v2081_v11 = vshrl.u32 %v366_v4, 7 }
  0x8c   : > { %v295_v6 = vmax.f32 %v291_v3, -2.0  ;;  %v293_v7 = vsub.f32 %v288_v1, %v291_v3  ;;  %v294_v8 = vsub.f32 %v1510_v2, %v292_v5  ;;  %v302_v9 = vmax.f32 %v292_v5, -2.0 }
  0x8d   : > { %v2086_v19 = vadd.s32 120, %v2081_v11  ;;  %v2089_v20 = vsub.s32 0, %v2081_v11  ;;  %v2094_v23 = vsub.s32 1, %v2081_v11  ;;  %v2097_v24 = vadd.s32 112, %v2081_v11 }
  0x8e   : > { %v296_v10 = vmin.f32 %v295_v6, 16.0  ;;  %v303_v12 = vmin.f32 %v302_v9, 16.0  ;;  %v309_v15 = vsub.f32 1.0, %v293_v7  ;;  %v310_v16 = vsub.f32 1.0, %v294_v8 }
  0x8f   : > { %v2091_v22 = vmul.f32 %v294_v8, %v293_v7  ;;  %v2102_v26 = vadd.s32 104, %v2081_v11  ;;  %v2105_v27 = vadd.s32 96, %v2081_v11  ;;  %v2108_v30 = vadd.s32 88, %v2081_v11 }
  0x90   : > { %v1522_v13 = vtrunc.f32 %v296_v10  ;;  %v1524_v14 = vtrunc.f32 %v303_v12  ;;  %v2099_v25 = vmul.f32 %v309_v15, %v294_v8  ;;  %v311_v29 = vmul.f32 %v310_v16, %v309_v15 }
  0x91   : > { %v332_v32 = vmul.f32 %v310_v16, %v293_v7  ;;  %v2111_v33 = vadd.s32 80, %v2081_v11  ;;  %v2114_v35 = vadd.s32 72, %v2081_v11  ;;  %v2117_v36 = vadd.s32 64, %v2081_v11 }
  0x92   : > { %v1523_v17 = vcvt.f32.s32 %v1522_v13  ;;  %v1525_v21 = vcvt.f32.s32 %v1524_v14  ;;  %v2128_v43 = vadd.s32 56, %v2081_v11  ;;  %v2131_v44 = vadd.s32 48, %v2081_v11 }
  0x93   : > { %v2134_v45 = vadd.s32 40, %v2081_v11  ;;  %v2144_v52 = vadd.s32 32, %v2081_v11  ;;  %v2148_v55 = vadd.s32 24, %v2081_v11 }
  0x94   : > { %vm298_vm0 = vcmp.gt.s32.totalorder %v1523_v17, 4294967294  ;;  %vm305_vm1 = vcmp.gt.s32.totalorder %v1525_v21, 4294967294 }
  0x95   : > { %v299_v28 = vsel %vm298_vm0, %v1523_v17, 4294967294  ;;  %v306_v31 = vsel %vm305_vm1, %v1525_v21, 4294967294 }
  0x96   : > { %vm300_vm2 = vcmp.lt.s32.totalorder %v299_v28, 16  ;;  %vm307_vm3 = vcmp.lt.s32.totalorder %v306_v31, 16 }
  0x97   : > { %v301_v34 = vsel %vm300_vm2, %v299_v28, 16  ;;  %v308_v37 = vsel %vm307_vm3, %v306_v31, 16 }
  0x98   : > { %vm312_vm4 = vcmp.ge.s32.totalorder %v301_v34, 0  ;;  %vm313_vm5 = vcmp.lt.s32.totalorder %v301_v34, 16  ;;  %vm320_vm6 = vcmp.gt.s32.totalorder %v301_v34, 0  ;;  %vm315_vm8 = vcmp.ge.s32.totalorder %v308_v37, 0 }
  0x99   : > { %vm2119_vm7 = vmand %vm312_vm4, %vm313_vm5  ;;  %vm317_vm9 = vcmp.lt.s32.totalorder %v308_v37, 16  ;;  %v321_v39 = vsel %vm320_vm6, %v301_v34, 0  ;;  %vm324_vm10 = vcmp.gt.s32.totalorder %v308_v37, 0  ;;  %v333_v41 = vadd.s32 1, %v301_v34 }
  0x9a   : > { %vm316_vm11 = vmand %vm2119_vm7, %vm315_vm8  ;;  %vm322_vm12 = vcmp.lt.s32.totalorder %v321_v39, 15  ;;  %v325_v40 = vsel %vm324_vm10, %v308_v37, 0  ;;  %v347_v42 = vadd.s32 1, %v308_v37 }
  0x9b   : > { %vm318_vm13 = vmand %vm316_vm11, %vm317_vm9  ;;  %vm326_vm14 = vcmp.lt.s32.totalorder %v325_v40, 15  ;;  %v323_v46 = vsel %vm322_vm12, %v321_v39, 15  ;;  %vm334_vm15 = vcmp.ge.s32.totalorder %v333_v41, 0  ;;  %vm335_vm0 = vcmp.lt.s32.totalorder %v333_v41, 16 }
  0x9c   : > { %v327_v47 = vsel %vm326_vm14, %v325_v40, 15  ;;  %v319_v48 = vsel %vm318_vm13, %v311_v29, 0.0  ;;  %vm2136_vm1 = vmand %vm334_vm15, %vm335_vm0  ;;  %vm340_vm2 = vcmp.gt.s32.totalorder %v333_v41, 0  ;;  %vm348_vm3 = vcmp.ge.s32.totalorder %v347_v42, 0 }
  0x9d   : > { %v328_v49 = vmul.u32 16, %v327_v47  ;;  %vm337_vm4 = vmand %vm2136_vm1, %vm315_vm8  ;;  %v341_v51 = vsel %vm340_vm2, %v333_v41, 0  ;;  %vm350_vm5 = vcmp.lt.s32.totalorder %v347_v42, 16  ;;  %vm353_vm6 = vcmp.gt.s32.totalorder %v347_v42, 0 }
  0x9e   : > { %vm338_vm10 = vmand %vm337_vm4, %vm317_vm9  ;;  %vm342_vm11 = vcmp.lt.s32.totalorder %v341_v51, 15  ;;  %v354_v54 = vsel %vm353_vm6, %v347_v42, 0  ;;  %v2154_v58 = vrot.slane %v319_v48, %v2089_v20  ;;  %v2161_v62 = vrot.slane %v319_v48, %v2094_v23 }
  0x9f   : > { %v329_v53 = vadd.s32 %v328_v49, %v323_v46  ;;  %v339_v56 = vsel %vm338_vm10, %v332_v32, 0.0  ;;  %v343_v57 = vsel %vm342_vm11, %v341_v51, 15  ;;  %vm349_vm8 = vmand %vm2119_vm7, %vm348_vm3  ;;  %vm355_vm12 = vcmp.lt.s32.totalorder %v354_v54, 15 }
  0xa0   : > { %v344_v60 = vadd.s32 %v343_v57, %v328_v49  ;;  %vm351_vm9 = vmand %vm349_vm8, %vm350_vm5  ;;  %v356_v61 = vsel %vm355_vm12, %v354_v54, 15  ;;  %v2168_v1 = vrot.slane %v339_v56, %v2089_v20  ;;  %v2171_v2 = vrot.slane %v339_v56, %v2094_v23 }
  0xa1   : > { %v2157_v59 = vsub.s32 %v329_v53, %v2083_v18  ;;  %v352_v63 = vsel %vm351_vm9, %v2099_v25, 0.0  ;;  %v357_v0 = vmul.u32 16, %v356_v61  ;;  %vm361_vm7 = vmand %vm2136_vm1, %vm348_vm3 }
  0xa2   : > { %v2174_v3 = vsub.s32 %v344_v60, %v2083_v18  ;;  %vm362_vm13 = vmand %vm361_vm7, %vm350_vm5  ;;  %v2182_v5 = vrot.slane %v352_v63, %v2089_v20  ;;  %v2185_v6 = vrot.slane %v352_v63, %v2094_v23 }
  0xa3   : > { %v2179_v4 = vrot.slane %v2157_v59, %v2094_v23  ;;  %v358_v7 = vadd.s32 %v357_v0, %v323_v46  ;;  %v363_v8 = vsel %vm362_vm13, %v2091_v22, 0.0  ;;  %v364_v9 = vadd.s32 %v357_v0, %v343_v57 }
  0xa4   : > { %v2190_v10 = vrot.slane %v2157_v59, %v2089_v20  ;;  %v2196_v12 = vrot.slane %v2174_v3, %v2094_v23  ;;  %v2199_v13 = vrot.slane %v363_v8, %v2089_v20  ;;  %v2202_v14 = vrot.slane %v363_v8, %v2094_v23 }
  0xa5   : > { %vm422_vm14 = vcmp.eq.s32.totalorder %v2086_v19, %v2179_v4  ;;  %v2205_v15 = vsub.s32 %v358_v7, %v2083_v18  ;;  %v2208_v16 = vsub.s32 %v364_v9, %v2083_v18  ;;  %v2218_v22 = vrot.slane %v2174_v3, %v2089_v20 }
  0xa6   : > { %v465_v17 = vsel %vm422_vm14, %v2161_v62, 0.0  ;;  %vm421_vm15 = vcmp.eq.s32.totalorder %v2086_v19, %v2190_v10  ;;  %vm505_vm0 = vcmp.eq.s32.totalorder %v2086_v19, %v2196_v12  ;;  %vm420_vm1 = vcmp.eq.s32.totalorder %v2097_v24, %v2179_v4 }
  0xa7   : > { %v464_v21 = vsel %vm421_vm15, %v2154_v58, 0.0  ;;  %v548_v18 = vsel %vm505_vm0, %v2171_v2, 0.0  ;;  %v2225_v25 = vrot.slane %v2205_v15, %v2094_v23  ;;  %v2229_v28 = vrot.slane %v2208_v16, %v2094_v23 }
  0xa8   : > { %v2233_v29 = vrot.slane %v2205_v15, %v2089_v20  ;;  %v580_v31 = vadd.f32 %v548_v18, %v465_v17  ;;  %vm504_vm2 = vcmp.eq.s32.totalorder %v2086_v19, %v2218_v22  ;;  %v2239_v32 = vrot.slane %v2208_v16, %v2089_v20 }
  0xa9   : > { %v463_v34 = vsel %vm420_vm1, %v2161_v62, 0.0  ;;  %vm620_vm3 = vcmp.eq.s32.totalorder %v2086_v19, %v2225_v25  ;;  %vm735_vm4 = vcmp.eq.s32.totalorder %v2086_v19, %v2229_v28  ;;  %v547_v37 = vsel %vm504_vm2, %v2168_v1, 0.0 }
  0xaa   : > { %vm619_vm5 = vcmp.eq.s32.totalorder %v2086_v19, %v2233_v29  ;;  %v663_v38 = vsel %vm620_vm3, %v2185_v6, 0.0  ;;  %v778_v39 = vsel %vm735_vm4, %v2202_v14, 0.0  ;;  %v579_v40 = vadd.f32 %v547_v37, %v464_v21 }
  0xab   : > { %v662_v41 = vsel %vm619_vm5, %v2182_v5, 0.0  ;;  %v695_v42 = vadd.f32 %v663_v38, %v580_v31  ;;  %vm734_vm6 = vcmp.eq.s32.totalorder %v2086_v19, %v2239_v32  ;;  %vm503_vm10 = vcmp.eq.s32.totalorder %v2097_v24, %v2196_v12 }
  0xac   : > { %vm618_vm11 = vcmp.eq.s32.totalorder %v2097_v24, %v2225_v25  ;;  %v694_v46 = vadd.f32 %v662_v41, %v579_v40  ;;  %v777_v47 = vsel %vm734_vm6, %v2199_v13, 0.0  ;;  %v546_v48 = vsel %vm503_vm10, %v2171_v2, 0.0 }
  0xad   : > { %v661_v49 = vsel %vm618_vm11, %v2185_v6, 0.0  ;;  %v810_v50 = vadd.f32 %v778_v39, %v695_v42  ;;  %v578_v51 = vadd.f32 %v546_v48, %v463_v34  ;;  %vm733_vm8 = vcmp.eq.s32.totalorder %v2097_v24, %v2229_v28 }
  0xae   : > { %vm419_vm12 = vcmp.eq.s32.totalorder %v2097_v24, %v2190_v10  ;;  %v809_v53 = vadd.f32 %v777_v47, %v694_v46  ;;  %v776_v54 = vsel %vm733_vm8, %v2202_v14, 0.0  ;;  %vm502_vm9 = vcmp.eq.s32.totalorder %v2097_v24, %v2218_v22 }
  0xaf   : > { %v462_v56 = vsel %vm419_vm12, %v2154_v58, 0.0  ;;  %814 = vmatprep.subr.mxu0 %v810_v50  ;;  %v693_v57 = vadd.f32 %v661_v49, %v578_v51  ;;  %v545_v60 = vsel %vm502_vm9, %v2168_v1, 0.0  ;;  %vm617_vm7 = vcmp.eq.s32.totalorder %v2097_v24, %v2233_v29 }
  0xb0   : > { %vm732_vm13 = vcmp.eq.s32.totalorder %v2097_v24, %v2239_v32  ;;  %815 = vmatpush1.msra.mxu0 %v809_v53  ;;  %v577_v61 = vadd.f32 %v545_v60, %v462_v56  ;;  %v660_v63 = vsel %vm617_vm7, %v2182_v5, 0.0  ;;  %vm418_vm14 = vcmp.eq.s32.totalorder %v2102_v26, %v2179_v4 }
  0xb1   : > { %v775_v0 = vsel %vm732_vm13, %v2199_v13, 0.0  ;;  %v808_v7 = vadd.f32 %v776_v54, %v693_v57  ;;  %v461_v8 = vsel %vm418_vm14, %v2161_v62, 0.0  ;;  %vm501_vm15 = vcmp.eq.s32.totalorder %v2102_v26, %v2196_v12 }
  0xb2   : > { %vm616_vm0 = vcmp.eq.s32.totalorder %v2102_v26, %v2225_v25  ;;  %v692_v9 = vadd.f32 %v660_v63, %v577_v61  ;;  %v544_v17 = vsel %vm501_vm15, %v2171_v2, 0.0  ;;  %vm731_vm1 = vcmp.eq.s32.totalorder %v2102_v26, %v2229_v28 }
  0xb3   : > { %v659_v21 = vsel %vm616_vm0, %v2185_v6, 0.0  ;;  %816 = vmatprep.subr.mxu0 %v808_v7  ;;  %v576_v18 = vadd.f32 %v544_v17, %v461_v8  ;;  %v774_v31 = vsel %vm731_vm1, %v2202_v14, 0.0  ;;  %vm417_vm2 = vcmp.eq.s32.totalorder %v2102_v26, %v2190_v10 }
  0xb4   : > { %vm500_vm3 = vcmp.eq.s32.totalorder %v2102_v26, %v2218_v22  ;;  %v807_v34 = vadd.f32 %v775_v0, %v692_v9  ;;  %v460_v37 = vsel %vm417_vm2, %v2154_v58, 0.0  ;;  %vm615_vm4 = vcmp.eq.s32.totalorder %v2102_v26, %v2233_v29 }
  0xb5   : > { %v543_v38 = vsel %vm500_vm3, %v2168_v1, 0.0  ;;  %v691_v39 = vadd.f32 %v659_v21, %v576_v18  ;;  %v658_v41 = vsel %vm615_vm4, %v2182_v5, 0.0  ;;  %vm730_vm5 = vcmp.eq.s32.totalorder %v2102_v26, %v2239_v32 }
  0xb6   : > { %v575_v40 = vadd.f32 %v543_v38, %v460_v37  ;;  %817 = vmatpush1.msra.mxu0 %v807_v34  ;;  %v773_v42 = vsel %vm730_vm5, %v2199_v13, 0.0  ;;  %vm416_vm6 = vcmp.eq.s32.totalorder %v2105_v27, %v2179_v4  ;;  %vm499_vm10 = vcmp.eq.s32.totalorder %v2105_v27, %v2196_v12 }
  0xb7   : > { %vm614_vm11 = vcmp.eq.s32.totalorder %v2105_v27, %v2225_v25  ;;  %v806_v46 = vadd.f32 %v774_v31, %v691_v39  ;;  %v459_v48 = vsel %vm416_vm6, %v2161_v62, 0.0  ;;  %v542_v49 = vsel %vm499_vm10, %v2171_v2, 0.0 }
  0xb8   : > { %v690_v47 = vadd.f32 %v658_v41, %v575_v40  ;;  %v574_v50 = vadd.f32 %v542_v49, %v459_v48  ;;  %v657_v51 = vsel %vm614_vm11, %v2185_v6, 0.0  ;;  %vm729_vm8 = vcmp.eq.s32.totalorder %v2105_v27, %v2229_v28 }
  0xb9   : > { %vm415_vm12 = vcmp.eq.s32.totalorder %v2105_v27, %v2190_v10  ;;  %818 = vmatprep.subr.mxu0 %v806_v46  ;;  %v772_v54 = vsel %vm729_vm8, %v2202_v14, 0.0  ;;  %vm498_vm9 = vcmp.eq.s32.totalorder %v2105_v27, %v2218_v22  ;;  %vm613_vm7 = vcmp.eq.s32.totalorder %v2105_v27, %v2233_v29 }
  0xba   : > { %v805_v53 = vadd.f32 %v773_v42, %v690_v47  ;;  %v458_v56 = vsel %vm415_vm12, %v2154_v58, 0.0  ;;  %v689_v57 = vadd.f32 %v657_v51, %v574_v50  ;;  %v541_v60 = vsel %vm498_vm9, %v2168_v1, 0.0 }
  0xbb   : > { %vm728_vm13 = vcmp.eq.s32.totalorder %v2105_v27, %v2239_v32  ;;  %v573_v61 = vadd.f32 %v541_v60, %v458_v56  ;;  %v656_v63 = vsel %vm613_vm7, %v2182_v5, 0.0  ;;  %vm414_vm14 = vcmp.eq.s32.totalorder %v2108_v30, %v2179_v4 }
  0xbc   : > { %819 = vmatpush1.msra.mxu0 %v805_v53  ;;  %v771_v0 = vsel %vm728_vm13, %v2199_v13, 0.0  ;;  %v804_v7 = vadd.f32 %v772_v54, %v689_v57  ;;  %v457_v8 = vsel %vm414_vm14, %v2161_v62, 0.0  ;;  %vm497_vm15 = vcmp.eq.s32.totalorder %v2108_v30, %v2196_v12 }
  0xbd   : > { %vm612_vm0 = vcmp.eq.s32.totalorder %v2108_v30, %v2225_v25  ;;  %v688_v9 = vadd.f32 %v656_v63, %v573_v61  ;;  %v540_v17 = vsel %vm497_vm15, %v2171_v2, 0.0  ;;  %vm727_vm1 = vcmp.eq.s32.totalorder %v2108_v30, %v2229_v28 }
  0xbe   : > { %v655_v21 = vsel %vm612_vm0, %v2185_v6, 0.0  ;;  %820 = vmatprep.subr.mxu0 %v804_v7  ;;  %v572_v18 = vadd.f32 %v540_v17, %v457_v8  ;;  %v770_v31 = vsel %vm727_vm1, %v2202_v14, 0.0  ;;  %v1511_v34 = vadd.s32 4294967168, %v2157_v59 }
  0xbf   : > { %v1512_v37 = vadd.s32 4294967168, %v2174_v3  ;;  %v803_v38 = vadd.f32 %v771_v0, %v688_v9  ;;  %v1513_v39 = vadd.s32 4294967168, %v2205_v15  ;;  %v1514_v40 = vadd.s32 4294967168, %v2208_v16 }
  0xc0   : > { %vm413_vm2 = vcmp.eq.s32.totalorder %v2108_v30, %v2190_v10  ;;  %v687_v41 = vadd.f32 %v655_v21, %v572_v18  ;;  %v2343_v42 = vrot.slane %v1511_v34, %v2094_v23  ;;  %vm496_vm3 = vcmp.eq.s32.totalorder %v2108_v30, %v2218_v22 }
  0xc1   : > { %v2346_v46 = vrot.slane %v1512_v37, %v2094_v23  ;;  %v456_v47 = vsel %vm413_vm2, %v2154_v58, 0.0  ;;  %821 = vmatpush1.msra.mxu0 %v803_v38  ;;  %v2350_v59 = vrot.slane %v1513_v39, %v2094_v23  ;;  %v2353_v3 = vrot.slane %v1514_v40, %v2094_v23 }
  0xc2   : > { %vm611_vm4 = vcmp.eq.s32.totalorder %v2108_v30, %v2233_v29  ;;  %v802_v15 = vadd.f32 %v770_v31, %v687_v41  ;;  %vm929_vm5 = vcmp.eq.s32.totalorder %v2086_v19, %v2343_v42  ;;  %v539_v16 = vsel %vm496_vm3, %v2168_v1, 0.0 }
  0xc3   : > { %vm1002_vm6 = vcmp.eq.s32.totalorder %v2086_v19, %v2346_v46  ;;  %v961_v48 = vsel %vm929_vm5, %v2161_v62, 0.0  ;;  %vm1107_vm10 = vcmp.eq.s32.totalorder %v2086_v19, %v2350_v59  ;;  %vm1212_vm11 = vcmp.eq.s32.totalorder %v2086_v19, %v2353_v3 }
  0xc4   : > { %v1034_v23 = vsel %vm1002_vm6, %v2171_v2, 0.0  ;;  %822 = vmatprep.subr.mxu0 %v802_v15  ;;  %v1139_v50 = vsel %vm1107_vm10, %v2185_v6, 0.0  ;;  %v1244_v51 = vsel %vm1212_vm11, %v2202_v14, 0.0  ;;  %v571_v53 = vadd.f32 %v539_v16, %v456_v47 }
  0xc5   : > { %v1066_v49 = vadd.f32 %v1034_v23, %v961_v48  ;;  %v654_v54 = vsel %vm611_vm4, %v2182_v5, 0.0  ;;  %vm726_vm8 = vcmp.eq.s32.totalorder %v2108_v30, %v2239_v32  ;;  %v2376_v56 = vrot.slane %v1511_v34, %v2089_v20 }
  0xc6   : > { %v2379_v57 = vrot.slane %v1512_v37, %v2089_v20  ;;  %v686_v61 = vadd.f32 %v654_v54, %v571_v53  ;;  %v769_v63 = vsel %vm726_vm8, %v2199_v13, 0.0  ;;  %v2383_v0 = vrot.slane %v1513_v39, %v2089_v20 }
  0xc7   : > { %v1171_v60 = vadd.f32 %v1139_v50, %v1066_v49  ;;  %vm928_vm12 = vcmp.eq.s32.totalorder %v2086_v19, %v2376_v56  ;;  %v2390_v7 = vrot.slane %v1514_v40, %v2089_v20  ;;  %vm412_vm7 = vcmp.eq.s32.totalorder %v2111_v33, %v2179_v4 }
  0xc8   : > { %vm1001_vm9 = vcmp.eq.s32.totalorder %v2086_v19, %v2379_v57  ;;  %v801_v9 = vadd.f32 %v769_v63, %v686_v61  ;;  %v960_v17 = vsel %vm928_vm12, %v2154_v58, 0.0  ;;  %vm1106_vm13 = vcmp.eq.s32.totalorder %v2086_v19, %v2383_v0 }
  0xc9   : > { %v1276_v8 = vadd.f32 %v1244_v51, %v1171_v60  ;;  %v1033_v21 = vsel %vm1001_vm9, %v2168_v1, 0.0  ;;  %vm1211_vm14 = vcmp.eq.s32.totalorder %v2086_v19, %v2390_v7  ;;  %v455_v31 = vsel %vm412_vm7, %v2161_v62, 0.0 }
  0xca   : > { %v1065_v18 = vadd.f32 %v1033_v21, %v960_v17  ;;  %823 = vmatpush1.msra.mxu0 %v801_v9  ;;  %v1138_v20 = vsel %vm1106_vm13, %v2182_v5, 0.0  ;;  %v1243_v34 = vsel %vm1211_vm14, %v2199_v13, 0.0  ;;  %vm495_vm15 = vcmp.eq.s32.totalorder %v2111_v33, %v2196_v12 }
  0xcb   : > { %1280 = vmatprep.subr.mxu1 %v1276_v8  ;;  %vm610_vm0 = vcmp.eq.s32.totalorder %v2111_v33, %v2225_v25  ;;  %v538_v38 = vsel %vm495_vm15, %v2171_v2, 0.0  ;;  %vm725_vm1 = vcmp.eq.s32.totalorder %v2111_v33, %v2229_v28  ;;  %vm927_vm2 = vcmp.eq.s32.totalorder %v2097_v24, %v2343_v42 }
  0xcc   : > { %v1170_v37 = vadd.f32 %v1138_v20, %v1065_v18  ;;  %v653_v39 = vsel %vm610_vm0, %v2185_v6, 0.0  ;;  %v570_v19 = vadd.f32 %v538_v38, %v455_v31  ;;  %v768_v40 = vsel %vm725_vm1, %v2202_v14, 0.0 }
  0xcd   : > { %vm1000_vm3 = vcmp.eq.s32.totalorder %v2097_v24, %v2346_v46  ;;  %v959_v47 = vsel %vm927_vm2, %v2161_v62, 0.0  ;;  %vm1105_vm4 = vcmp.eq.s32.totalorder %v2097_v24, %v2350_v59  ;;  %vm1210_vm5 = vcmp.eq.s32.totalorder %v2097_v24, %v2353_v3 }
  0xce   : > { %v1275_v41 = vadd.f32 %v1243_v34, %v1170_v37  ;;  %v1032_v15 = vsel %vm1000_vm3, %v2171_v2, 0.0  ;;  %v685_v16 = vadd.f32 %v653_v39, %v570_v19  ;;  %v1137_v23 = vsel %vm1105_vm4, %v2185_v6, 0.0 }
  0xcf   : > { %v1064_v48 = vadd.f32 %v1032_v15, %v959_v47  ;;  %v1242_v49 = vsel %vm1210_vm5, %v2202_v14, 0.0  ;;  %vm411_vm6 = vcmp.eq.s32.totalorder %v2111_v33, %v2190_v10  ;;  %vm494_vm10 = vcmp.eq.s32.totalorder %v2111_v33, %v2218_v22 }
  0xd0   : > { %1281 = vmatpush1.msra.mxu1 %v1275_v41  ;;  %vm609_vm11 = vcmp.eq.s32.totalorder %v2111_v33, %v2233_v29  ;;  %v800_v50 = vadd.f32 %v768_v40, %v685_v16  ;;  %v454_v53 = vsel %vm411_vm6, %v2154_v58, 0.0  ;;  %v537_v54 = vsel %vm494_vm10, %v2168_v1, 0.0 }
  0xd1   : > { %v1169_v51 = vadd.f32 %v1137_v23, %v1064_v48  ;;  %v569_v60 = vadd.f32 %v537_v54, %v454_v53  ;;  %v652_v61 = vsel %vm609_vm11, %v2182_v5, 0.0  ;;  %vm724_vm8 = vcmp.eq.s32.totalorder %v2111_v33, %v2239_v32 }
  0xd2   : > { %vm926_vm12 = vcmp.eq.s32.totalorder %v2097_v24, %v2376_v56  ;;  %824 = vmatprep.subr.mxu0 %v800_v50  ;;  %v767_v8 = vsel %vm724_vm8, %v2199_v13, 0.0  ;;  %vm999_vm9 = vcmp.eq.s32.totalorder %v2097_v24, %v2379_v57  ;;  %vm1104_vm7 = vcmp.eq.s32.totalorder %v2097_v24, %v2383_v0 }
  0xd3   : > { %v1274_v63 = vadd.f32 %v1242_v49, %v1169_v51  ;;  %v958_v9 = vsel %vm926_vm12, %v2154_v58, 0.0  ;;  %v684_v17 = vadd.f32 %v652_v61, %v569_v60  ;;  %v1031_v21 = vsel %vm999_vm9, %v2168_v1, 0.0 }
  0xd4   : > { %vm1209_vm13 = vcmp.eq.s32.totalorder %v2097_v24, %v2390_v7  ;;  %v1063_v18 = vadd.f32 %v1031_v21, %v958_v9  ;;  %v1136_v31 = vsel %vm1104_vm7, %v2182_v5, 0.0  ;;  %vm410_vm14 = vcmp.eq.s32.totalorder %v2114_v35, %v2179_v4 }
  0xd5   : > { %1282 = vmatprep.subr.mxu1 %v1274_v63  ;;  %v1241_v20 = vsel %vm1209_vm13, %v2199_v13, 0.0  ;;  %v799_v34 = vadd.f32 %v767_v8, %v684_v17  ;;  %v453_v37 = vsel %vm410_vm14, %v2161_v62, 0.0  ;;  %vm493_vm15 = vcmp.eq.s32.totalorder %v2114_v35, %v2196_v12 }
  0xd6   : > { %vm608_vm0 = vcmp.eq.s32.totalorder %v2114_v35, %v2225_v25  ;;  %v1168_v38 = vadd.f32 %v1136_v31, %v1063_v18  ;;  %v536_v24 = vsel %vm493_vm15, %v2171_v2, 0.0  ;;  %vm723_vm1 = vcmp.eq.s32.totalorder %v2114_v35, %v2229_v28 }
  0xd7   : > { %v651_v39 = vsel %vm608_vm0, %v2185_v6, 0.0  ;;  %825 = vmatpush1.msra.mxu0 %v799_v34  ;;  %v568_v19 = vadd.f32 %v536_v24, %v453_v37  ;;  %v766_v40 = vsel %vm723_vm1, %v2202_v14, 0.0  ;;  %vm925_vm2 = vcmp.eq.s32.totalorder %v2102_v26, %v2343_v42 }
  0xd8   : > { %vm998_vm3 = vcmp.eq.s32.totalorder %v2102_v26, %v2346_v46  ;;  %v1273_v41 = vadd.f32 %v1241_v20, %v1168_v38  ;;  %v957_v47 = vsel %vm925_vm2, %v2161_v62, 0.0  ;;  %vm1103_vm4 = vcmp.eq.s32.totalorder %v2102_v26, %v2350_v59 }
  0xd9   : > { %v1030_v15 = vsel %vm998_vm3, %v2171_v2, 0.0  ;;  %v683_v16 = vadd.f32 %v651_v39, %v568_v19  ;;  %v1135_v23 = vsel %vm1103_vm4, %v2185_v6, 0.0  ;;  %vm1208_vm5 = vcmp.eq.s32.totalorder %v2102_v26, %v2353_v3 }
  0xda   : > { %v1062_v48 = vadd.f32 %v1030_v15, %v957_v47  ;;  %1283 = vmatpush1.msra.mxu1 %v1273_v41  ;;  %v1240_v49 = vsel %vm1208_vm5, %v2202_v14, 0.0  ;;  %vm409_vm6 = vcmp.eq.s32.totalorder %v2114_v35, %v2190_v10  ;;  %vm492_vm10 = vcmp.eq.s32.totalorder %v2114_v35, %v2218_v22 }
  0xdb   : > { %vm607_vm11 = vcmp.eq.s32.totalorder %v2114_v35, %v2233_v29  ;;  %v798_v50 = vadd.f32 %v766_v40, %v683_v16  ;;  %v452_v53 = vsel %vm409_vm6, %v2154_v58, 0.0  ;;  %v535_v54 = vsel %vm492_vm10, %v2168_v1, 0.0 }
  0xdc   : > { %v1167_v51 = vadd.f32 %v1135_v23, %v1062_v48  ;;  %v567_v60 = vadd.f32 %v535_v54, %v452_v53  ;;  %v650_v61 = vsel %vm607_vm11, %v2182_v5, 0.0  ;;  %vm722_vm8 = vcmp.eq.s32.totalorder %v2114_v35, %v2239_v32 }
  0xdd   : > { %vm924_vm12 = vcmp.eq.s32.totalorder %v2102_v26, %v2376_v56  ;;  %826 = vmatprep.subr.mxu0 %v798_v50  ;;  %v765_v8 = vsel %vm722_vm8, %v2199_v13, 0.0  ;;  %vm997_vm9 = vcmp.eq.s32.totalorder %v2102_v26, %v2379_v57  ;;  %vm1102_vm7 = vcmp.eq.s32.totalorder %v2102_v26, %v2383_v0 }
  0xde   : > { %v1272_v63 = vadd.f32 %v1240_v49, %v1167_v51  ;;  %v956_v9 = vsel %vm924_vm12, %v2154_v58, 0.0  ;;  %v682_v17 = vadd.f32 %v650_v61, %v567_v60  ;;  %v1029_v21 = vsel %vm997_vm9, %v2168_v1, 0.0 }
  0xdf   : > { %vm1207_vm13 = vcmp.eq.s32.totalorder %v2102_v26, %v2390_v7  ;;  %v1061_v18 = vadd.f32 %v1029_v21, %v956_v9  ;;  %v1134_v31 = vsel %vm1102_vm7, %v2182_v5, 0.0  ;;  %vm408_vm14 = vcmp.eq.s32.totalorder %v2117_v36, %v2179_v4 }
  0xe0   : > { %1284 = vmatprep.subr.mxu1 %v1272_v63  ;;  %v1239_v20 = vsel %vm1207_vm13, %v2199_v13, 0.0  ;;  %v797_v34 = vadd.f32 %v765_v8, %v682_v17  ;;  %v451_v37 = vsel %vm408_vm14, %v2161_v62, 0.0  ;;  %vm491_vm15 = vcmp.eq.s32.totalorder %v2117_v36, %v2196_v12 }
  0xe1   : > { %vm606_vm0 = vcmp.eq.s32.totalorder %v2117_v36, %v2225_v25  ;;  %v1166_v38 = vadd.f32 %v1134_v31, %v1061_v18  ;;  %v534_v26 = vsel %vm491_vm15, %v2171_v2, 0.0  ;;  %vm721_vm1 = vcmp.eq.s32.totalorder %v2117_v36, %v2229_v28 }
  0xe2   : > { %v649_v24 = vsel %vm606_vm0, %v2185_v6, 0.0  ;;  %827 = vmatpush1.msra.mxu0 %v797_v34  ;;  %v566_v39 = vadd.f32 %v534_v26, %v451_v37  ;;  %v764_v19 = vsel %vm721_vm1, %v2202_v14, 0.0  ;;  %vm923_vm2 = vcmp.eq.s32.totalorder %v2105_v27, %v2343_v42 }
  0xe3   : > { %vm996_vm3 = vcmp.eq.s32.totalorder %v2105_v27, %v2346_v46  ;;  %v1271_v40 = vadd.f32 %v1239_v20, %v1166_v38  ;;  %v955_v41 = vsel %vm923_vm2, %v2161_v62, 0.0  ;;  %vm1101_vm4 = vcmp.eq.s32.totalorder %v2105_v27, %v2350_v59 }
  0xe4   : > { %v1028_v47 = vsel %vm996_vm3, %v2171_v2, 0.0  ;;  %v681_v15 = vadd.f32 %v649_v24, %v566_v39  ;;  %v1133_v48 = vsel %vm1101_vm4, %v2185_v6, 0.0  ;;  %vm1206_vm5 = vcmp.eq.s32.totalorder %v2105_v27, %v2353_v3 }
  0xe5   : > { %v1060_v16 = vadd.f32 %v1028_v47, %v955_v41  ;;  %1285 = vmatpush1.msra.mxu1 %v1271_v40  ;;  %v1238_v23 = vsel %vm1206_vm5, %v2202_v14, 0.0  ;;  %vm407_vm6 = vcmp.eq.s32.totalorder %v2117_v36, %v2190_v10  ;;  %vm490_vm10 = vcmp.eq.s32.totalorder %v2117_v36, %v2218_v22 }
  0xe6   : > { %vm605_vm11 = vcmp.eq.s32.totalorder %v2117_v36, %v2233_v29  ;;  %v796_v49 = vadd.f32 %v764_v19, %v681_v15  ;;  %v450_v51 = vsel %vm407_vm6, %v2154_v58, 0.0  ;;  %v533_v53 = vsel %vm490_vm10, %v2168_v1, 0.0 }
  0xe7   : > { %v1165_v50 = vadd.f32 %v1133_v48, %v1060_v16  ;;  %v565_v54 = vadd.f32 %v533_v53, %v450_v51  ;;  %v648_v60 = vsel %vm605_vm11, %v2182_v5, 0.0  ;;  %vm720_vm8 = vcmp.eq.s32.totalorder %v2117_v36, %v2239_v32 }
  0xe8   : > { %vm922_vm12 = vcmp.eq.s32.totalorder %v2105_v27, %v2376_v56  ;;  %828 = vmatprep.subr.mxu0 %v796_v49  ;;  %v763_v63 = vsel %vm720_vm8, %v2199_v13, 0.0  ;;  %vm995_vm9 = vcmp.eq.s32.totalorder %v2105_v27, %v2379_v57  ;;  %vm1100_vm7 = vcmp.eq.s32.totalorder %v2105_v27, %v2383_v0 }
  0xe9   : > { %v1270_v61 = vadd.f32 %v1238_v23, %v1165_v50  ;;  %v954_v8 = vsel %vm922_vm12, %v2154_v58, 0.0  ;;  %v680_v9 = vadd.f32 %v648_v60, %v565_v54  ;;  %v1027_v17 = vsel %vm995_vm9, %v2168_v1, 0.0 }
  0xea   : > { %vm1205_vm13 = vcmp.eq.s32.totalorder %v2105_v27, %v2390_v7  ;;  %v1059_v21 = vadd.f32 %v1027_v17, %v954_v8  ;;  %v1132_v18 = vsel %vm1100_vm7, %v2182_v5, 0.0  ;;  %vm406_vm14 = vcmp.eq.s32.totalorder %v2128_v43, %v2179_v4 }
  0xeb   : > { %1286 = vmatprep.subr.mxu1 %v1270_v61  ;;  %v1237_v31 = vsel %vm1205_vm13, %v2199_v13, 0.0  ;;  %v795_v20 = vadd.f32 %v763_v63, %v680_v9  ;;  %v449_v34 = vsel %vm406_vm14, %v2161_v62, 0.0  ;;  %vm489_vm15 = vcmp.eq.s32.totalorder %v2128_v43, %v2196_v12 }
  0xec   : > { %vm604_vm0 = vcmp.eq.s32.totalorder %v2128_v43, %v2225_v25  ;;  %v1164_v37 = vadd.f32 %v1132_v18, %v1059_v21  ;;  %v532_v27 = vsel %vm489_vm15, %v2171_v2, 0.0  ;;  %vm719_vm1 = vcmp.eq.s32.totalorder %v2128_v43, %v2229_v28 }
  0xed   : > { %v647_v38 = vsel %vm604_vm0, %v2185_v6, 0.0  ;;  %829 = vmatpush1.msra.mxu0 %v795_v20  ;;  %v564_v26 = vadd.f32 %v532_v27, %v449_v34  ;;  %v762_v24 = vsel %vm719_vm1, %v2202_v14, 0.0  ;;  %vm921_vm2 = vcmp.eq.s32.totalorder %v2108_v30, %v2343_v42 }
  0xee   : > { %vm994_vm3 = vcmp.eq.s32.totalorder %v2108_v30, %v2346_v46  ;;  %v1269_v39 = vadd.f32 %v1237_v31, %v1164_v37  ;;  %v953_v19 = vsel %vm921_vm2, %v2161_v62, 0.0  ;;  %vm1099_vm4 = vcmp.eq.s32.totalorder %v2108_v30, %v2350_v59 }
  0xef   : > { %v1026_v40 = vsel %vm994_vm3, %v2171_v2, 0.0  ;;  %v679_v41 = vadd.f32 %v647_v38, %v564_v26  ;;  %v1131_v15 = vsel %vm1099_vm4, %v2185_v6, 0.0  ;;  %vm1204_vm5 = vcmp.eq.s32.totalorder %v2108_v30, %v2353_v3 }
  0xf0   : > { %v1058_v47 = vadd.f32 %v1026_v40, %v953_v19  ;;  %1287 = vmatpush1.msra.mxu1 %v1269_v39  ;;  %v1236_v16 = vsel %vm1204_vm5, %v2202_v14, 0.0  ;;  %vm405_vm6 = vcmp.eq.s32.totalorder %v2128_v43, %v2190_v10  ;;  %vm488_vm10 = vcmp.eq.s32.totalorder %v2128_v43, %v2218_v22 }
  0xf1   : > { %vm603_vm11 = vcmp.eq.s32.totalorder %v2128_v43, %v2233_v29  ;;  %v794_v48 = vadd.f32 %v762_v24, %v679_v41  ;;  %v448_v49 = vsel %vm405_vm6, %v2154_v58, 0.0  ;;  %v531_v50 = vsel %vm488_vm10, %v2168_v1, 0.0 }
  0xf2   : > { %v1163_v23 = vadd.f32 %v1131_v15, %v1058_v47  ;;  %v563_v51 = vadd.f32 %v531_v50, %v448_v49  ;;  %v646_v53 = vsel %vm603_vm11, %v2182_v5, 0.0  ;;  %vm718_vm8 = vcmp.eq.s32.totalorder %v2128_v43, %v2239_v32 }
  0xf3   : > { %vm920_vm12 = vcmp.eq.s32.totalorder %v2108_v30, %v2376_v56  ;;  %830 = vmatprep.subr.mxu0 %v794_v48  ;;  %v761_v60 = vsel %vm718_vm8, %v2199_v13, 0.0  ;;  %vm993_vm9 = vcmp.eq.s32.totalorder %v2108_v30, %v2379_v57  ;;  %vm1098_vm7 = vcmp.eq.s32.totalorder %v2108_v30, %v2383_v0 }
  0xf4   : > { %v1268_v54 = vadd.f32 %v1236_v16, %v1163_v23  ;;  %v952_v61 = vsel %vm920_vm12, %v2154_v58, 0.0  ;;  %v678_v63 = vadd.f32 %v646_v53, %v563_v51  ;;  %v1025_v8 = vsel %vm993_vm9, %v2168_v1, 0.0 }
  0xf5   : > { %vm1203_vm13 = vcmp.eq.s32.totalorder %v2108_v30, %v2390_v7  ;;  %v1057_v9 = vadd.f32 %v1025_v8, %v952_v61  ;;  %v1130_v17 = vsel %vm1098_vm7, %v2182_v5, 0.0  ;;  %vm404_vm14 = vcmp.eq.s32.totalorder %v2131_v44, %v2179_v4 }
  0xf6   : > { %1288 = vmatprep.subr.mxu1 %v1268_v54  ;;  %v1235_v21 = vsel %vm1203_vm13, %v2199_v13, 0.0  ;;  %v793_v18 = vadd.f32 %v761_v60, %v678_v63  ;;  %v447_v31 = vsel %vm404_vm14, %v2161_v62, 0.0  ;;  %vm487_vm15 = vcmp.eq.s32.totalorder %v2131_v44, %v2196_v12 }
  0xf7   : > { %vm602_vm0 = vcmp.eq.s32.totalorder %v2131_v44, %v2225_v25  ;;  %v1162_v20 = vadd.f32 %v1130_v17, %v1057_v9  ;;  %v530_v30 = vsel %vm487_vm15, %v2171_v2, 0.0  ;;  %vm717_vm1 = vcmp.eq.s32.totalorder %v2131_v44, %v2229_v28 }
  0xf8   : > { %v645_v34 = vsel %vm602_vm0, %v2185_v6, 0.0  ;;  %831 = vmatpush1.msra.mxu0 %v793_v18  ;;  %v562_v37 = vadd.f32 %v530_v30, %v447_v31  ;;  %v760_v27 = vsel %vm717_vm1, %v2202_v14, 0.0  ;;  %vm919_vm2 = vcmp.eq.s32.totalorder %v2111_v33, %v2343_v42 }
  0xf9   : > { %vm992_vm3 = vcmp.eq.s32.totalorder %v2111_v33, %v2346_v46  ;;  %v1267_v38 = vadd.f32 %v1235_v21, %v1162_v20  ;;  %v951_v26 = vsel %vm919_vm2, %v2161_v62, 0.0  ;;  %vm1097_vm4 = vcmp.eq.s32.totalorder %v2111_v33, %v2350_v59 }
  0xfa   : > { %v1024_v24 = vsel %vm992_vm3, %v2171_v2, 0.0  ;;  %v677_v39 = vadd.f32 %v645_v34, %v562_v37  ;;  %v1129_v40 = vsel %vm1097_vm4, %v2185_v6, 0.0  ;;  %vm1202_vm5 = vcmp.eq.s32.totalorder %v2111_v33, %v2353_v3 }
  0xfb   : > { %v1056_v19 = vadd.f32 %v1024_v24, %v951_v26  ;;  %1289 = vmatpush1.msra.mxu1 %v1267_v38  ;;  %v1234_v41 = vsel %vm1202_vm5, %v2202_v14, 0.0  ;;  %vm403_vm6 = vcmp.eq.s32.totalorder %v2131_v44, %v2190_v10  ;;  %vm486_vm10 = vcmp.eq.s32.totalorder %v2131_v44, %v2218_v22 }
  0xfc   : > { %vm601_vm11 = vcmp.eq.s32.totalorder %v2131_v44, %v2233_v29  ;;  %v792_v47 = vadd.f32 %v760_v27, %v677_v39  ;;  %v446_v16 = vsel %vm403_vm6, %v2154_v58, 0.0  ;;  %v529_v48 = vsel %vm486_vm10, %v2168_v1, 0.0 }
  0xfd   : > { %v1161_v15 = vadd.f32 %v1129_v40, %v1056_v19  ;;  %v561_v23 = vadd.f32 %v529_v48, %v446_v16  ;;  %v644_v49 = vsel %vm601_vm11, %v2182_v5, 0.0  ;;  %vm716_vm8 = vcmp.eq.s32.totalorder %v2131_v44, %v2239_v32 }
  0xfe   : > { %vm918_vm12 = vcmp.eq.s32.totalorder %v2111_v33, %v2376_v56  ;;  %832 = vmatprep.subr.mxu0 %v792_v47  ;;  %v759_v51 = vsel %vm716_vm8, %v2199_v13, 0.0  ;;  %vm991_vm9 = vcmp.eq.s32.totalorder %v2111_v33, %v2379_v57  ;;  %vm1096_vm7 = vcmp.eq.s32.totalorder %v2111_v33, %v2383_v0 }
  0xff   : > { %v1266_v50 = vadd.f32 %v1234_v41, %v1161_v15  ;;  %v950_v53 = vsel %vm918_vm12, %v2154_v58, 0.0  ;;  %v676_v54 = vadd.f32 %v644_v49, %v561_v23  ;;  %v1023_v60 = vsel %vm991_vm9, %v2168_v1, 0.0 }
 0x100   : > { %vm1201_vm13 = vcmp.eq.s32.totalorder %v2111_v33, %v2390_v7  ;;  %v1055_v61 = vadd.f32 %v1023_v60, %v950_v53  ;;  %v1128_v63 = vsel %vm1096_vm7, %v2182_v5, 0.0  ;;  %vm402_vm14 = vcmp.eq.s32.totalorder %v2134_v45, %v2179_v4 }
 0x101   : > { %1290 = vmatprep.subr.mxu1 %v1266_v50  ;;  %v1233_v8 = vsel %vm1201_vm13, %v2199_v13, 0.0  ;;  %v791_v9 = vadd.f32 %v759_v51, %v676_v54  ;;  %v445_v17 = vsel %vm402_vm14, %v2161_v62, 0.0  ;;  %vm485_vm15 = vcmp.eq.s32.totalorder %v2134_v45, %v2196_v12 }
 0x102   : > { %vm600_vm0 = vcmp.eq.s32.totalorder %v2134_v45, %v2225_v25  ;;  %v1160_v21 = vadd.f32 %v1128_v63, %v1055_v61  ;;  %v528_v33 = vsel %vm485_vm15, %v2171_v2, 0.0  ;;  %vm715_vm1 = vcmp.eq.s32.totalorder %v2134_v45, %v2229_v28 }
 0x103   : > { %v643_v18 = vsel %vm600_vm0, %v2185_v6, 0.0  ;;  %833 = vmatpush1.msra.mxu0 %v791_v9  ;;  %v560_v31 = vadd.f32 %v528_v33, %v445_v17  ;;  %v758_v20 = vsel %vm715_vm1, %v2202_v14, 0.0  ;;  %vm917_vm2 = vcmp.eq.s32.totalorder %v2114_v35, %v2343_v42 }
 0x104   : > { %vm990_vm3 = vcmp.eq.s32.totalorder %v2114_v35, %v2346_v46  ;;  %v1265_v30 = vadd.f32 %v1233_v8, %v1160_v21  ;;  %v949_v34 = vsel %vm917_vm2, %v2161_v62, 0.0  ;;  %vm1095_vm4 = vcmp.eq.s32.totalorder %v2114_v35, %v2350_v59 }
 0x105   : > { %v1022_v37 = vsel %vm990_vm3, %v2171_v2, 0.0  ;;  %v675_v27 = vadd.f32 %v643_v18, %v560_v31  ;;  %v1127_v26 = vsel %vm1095_vm4, %v2185_v6, 0.0  ;;  %vm1200_vm5 = vcmp.eq.s32.totalorder %v2114_v35, %v2353_v3 }
 0x106   : > { %v1054_v38 = vadd.f32 %v1022_v37, %v949_v34  ;;  %1291 = vmatpush1.msra.mxu1 %v1265_v30  ;;  %v1232_v24 = vsel %vm1200_vm5, %v2202_v14, 0.0  ;;  %vm401_vm6 = vcmp.eq.s32.totalorder %v2134_v45, %v2190_v10  ;;  %vm484_vm10 = vcmp.eq.s32.totalorder %v2134_v45, %v2218_v22 }
 0x107   : > { %vm599_vm11 = vcmp.eq.s32.totalorder %v2134_v45, %v2233_v29  ;;  %v790_v39 = vadd.f32 %v758_v20, %v675_v27  ;;  %v444_v40 = vsel %vm401_vm6, %v2154_v58, 0.0  ;;  %v527_v41 = vsel %vm484_vm10, %v2168_v1, 0.0 }
 0x108   : > { %v1159_v19 = vadd.f32 %v1127_v26, %v1054_v38  ;;  %v559_v47 = vadd.f32 %v527_v41, %v444_v40  ;;  %v642_v15 = vsel %vm599_vm11, %v2182_v5, 0.0  ;;  %vm714_vm8 = vcmp.eq.s32.totalorder %v2134_v45, %v2239_v32 }
 0x109   : > { %vm916_vm12 = vcmp.eq.s32.totalorder %v2114_v35, %v2376_v56  ;;  %834 = vmatprep.subr.mxu0 %v790_v39  ;;  %v757_v48 = vsel %vm714_vm8, %v2199_v13, 0.0  ;;  %vm989_vm9 = vcmp.eq.s32.totalorder %v2114_v35, %v2379_v57  ;;  %vm1094_vm7 = vcmp.eq.s32.totalorder %v2114_v35, %v2383_v0 }
 0x10a   : > { %v1264_v16 = vadd.f32 %v1232_v24, %v1159_v19  ;;  %v948_v23 = vsel %vm916_vm12, %v2154_v58, 0.0  ;;  %v674_v49 = vadd.f32 %v642_v15, %v559_v47  ;;  %v1021_v50 = vsel %vm989_vm9, %v2168_v1, 0.0 }
 0x10b   : > { %vm1199_vm13 = vcmp.eq.s32.totalorder %v2114_v35, %v2390_v7  ;;  %v1053_v51 = vadd.f32 %v1021_v50, %v948_v23  ;;  %v1126_v53 = vsel %vm1094_vm7, %v2182_v5, 0.0  ;;  %vm400_vm14 = vcmp.eq.s32.totalorder %v2144_v52, %v2179_v4 }
 0x10c   : > { %1292 = vmatprep.subr.mxu1 %v1264_v16  ;;  %v1231_v54 = vsel %vm1199_vm13, %v2199_v13, 0.0  ;;  %v789_v60 = vadd.f32 %v757_v48, %v674_v49  ;;  %v443_v61 = vsel %vm400_vm14, %v2161_v62, 0.0  ;;  %vm483_vm15 = vcmp.eq.s32.totalorder %v2144_v52, %v2196_v12 }
 0x10d   : > { %vm598_vm0 = vcmp.eq.s32.totalorder %v2144_v52, %v2225_v25  ;;  %v1158_v63 = vadd.f32 %v1126_v53, %v1053_v51  ;;  %v526_v35 = vsel %vm483_vm15, %v2171_v2, 0.0  ;;  %vm713_vm1 = vcmp.eq.s32.totalorder %v2144_v52, %v2229_v28 }
 0x10e   : > { %v641_v8 = vsel %vm598_vm0, %v2185_v6, 0.0  ;;  %835 = vmatpush1.msra.mxu0 %v789_v60  ;;  %v558_v9 = vadd.f32 %v526_v35, %v443_v61  ;;  %v756_v17 = vsel %vm713_vm1, %v2202_v14, 0.0  ;;  %vm915_vm2 = vcmp.eq.s32.totalorder %v2117_v36, %v2343_v42 }
 0x10f   : > { %vm988_vm3 = vcmp.eq.s32.totalorder %v2117_v36, %v2346_v46  ;;  %v1263_v21 = vadd.f32 %v1231_v54, %v1158_v63  ;;  %v947_v33 = vsel %vm915_vm2, %v2161_v62, 0.0  ;;  %vm1093_vm4 = vcmp.eq.s32.totalorder %v2117_v36, %v2350_v59 }
 0x110   : > { %v1020_v18 = vsel %vm988_vm3, %v2171_v2, 0.0  ;;  %v673_v31 = vadd.f32 %v641_v8, %v558_v9  ;;  %v1125_v30 = vsel %vm1093_vm4, %v2185_v6, 0.0  ;;  %vm1198_vm5 = vcmp.eq.s32.totalorder %v2117_v36, %v2353_v3 }
 0x111   : > { %v1052_v20 = vadd.f32 %v1020_v18, %v947_v33  ;;  %1293 = vmatpush1.msra.mxu1 %v1263_v21  ;;  %v1230_v34 = vsel %vm1198_vm5, %v2202_v14, 0.0  ;;  %vm399_vm6 = vcmp.eq.s32.totalorder %v2144_v52, %v2190_v10  ;;  %vm482_vm10 = vcmp.eq.s32.totalorder %v2144_v52, %v2218_v22 }
 0x112   : > { %vm597_vm11 = vcmp.eq.s32.totalorder %v2144_v52, %v2233_v29  ;;  %v788_v37 = vadd.f32 %v756_v17, %v673_v31  ;;  %v442_v38 = vsel %vm399_vm6, %v2154_v58, 0.0  ;;  %v525_v26 = vsel %vm482_vm10, %v2168_v1, 0.0 }
 0x113   : > { %v1157_v27 = vadd.f32 %v1125_v30, %v1052_v20  ;;  %v557_v24 = vadd.f32 %v525_v26, %v442_v38  ;;  %v640_v39 = vsel %vm597_vm11, %v2182_v5, 0.0  ;;  %vm712_vm8 = vcmp.eq.s32.totalorder %v2144_v52, %v2239_v32 }
 0x114   : > { %vm914_vm12 = vcmp.eq.s32.totalorder %v2117_v36, %v2376_v56  ;;  %836 = vmatprep.subr.mxu0 %v788_v37  ;;  %v755_v40 = vsel %vm712_vm8, %v2199_v13, 0.0  ;;  %vm987_vm9 = vcmp.eq.s32.totalorder %v2117_v36, %v2379_v57  ;;  %vm1092_vm7 = vcmp.eq.s32.totalorder %v2117_v36, %v2383_v0 }
 0x115   : > { %v1262_v19 = vadd.f32 %v1230_v34, %v1157_v27  ;;  %v946_v41 = vsel %vm914_vm12, %v2154_v58, 0.0  ;;  %v672_v47 = vadd.f32 %v640_v39, %v557_v24  ;;  %v1019_v15 = vsel %vm987_vm9, %v2168_v1, 0.0 }
 0x116   : > { %vm1197_vm13 = vcmp.eq.s32.totalorder %v2117_v36, %v2390_v7  ;;  %v1051_v16 = vadd.f32 %v1019_v15, %v946_v41  ;;  %v1124_v48 = vsel %vm1092_vm7, %v2182_v5, 0.0  ;;  %vm398_vm14 = vcmp.eq.s32.totalorder %v2148_v55, %v2179_v4 }
 0x117   : > { %1294 = vmatprep.subr.mxu1 %v1262_v19  ;;  %v1229_v23 = vsel %vm1197_vm13, %v2199_v13, 0.0  ;;  %v787_v49 = vadd.f32 %v755_v40, %v672_v47  ;;  %v441_v50 = vsel %vm398_vm14, %v2161_v62, 0.0  ;;  %vm481_vm15 = vcmp.eq.s32.totalorder %v2148_v55, %v2196_v12 }
 0x118   : > { %vm596_vm0 = vcmp.eq.s32.totalorder %v2148_v55, %v2225_v25  ;;  %v1156_v51 = vadd.f32 %v1124_v48, %v1051_v16  ;;  %v524_v36 = vsel %vm481_vm15, %v2171_v2, 0.0  ;;  %vm711_vm1 = vcmp.eq.s32.totalorder %v2148_v55, %v2229_v28 }
 0x119   : > { %v639_v53 = vsel %vm596_vm0, %v2185_v6, 0.0  ;;  %837 = vmatpush1.msra.mxu0 %v787_v49  ;;  %v556_v54 = vadd.f32 %v524_v36, %v441_v50  ;;  %v754_v60 = vsel %vm711_vm1, %v2202_v14, 0.0  ;;  %vm913_vm2 = vcmp.eq.s32.totalorder %v2128_v43, %v2343_v42 }
 0x11a   : > { %vm986_vm3 = vcmp.eq.s32.totalorder %v2128_v43, %v2346_v46  ;;  %v1261_v61 = vadd.f32 %v1229_v23, %v1156_v51  ;;  %v945_v63 = vsel %vm913_vm2, %v2161_v62, 0.0  ;;  %vm1091_vm4 = vcmp.eq.s32.totalorder %v2128_v43, %v2350_v59 }
 0x11b   : > { %v1018_v35 = vsel %vm986_vm3, %v2171_v2, 0.0  ;;  %v671_v8 = vadd.f32 %v639_v53, %v556_v54  ;;  %v1123_v17 = vsel %vm1091_vm4, %v2185_v6, 0.0  ;;  %vm1196_vm5 = vcmp.eq.s32.totalorder %v2128_v43, %v2353_v3 }
 0x11c   : > { %v1050_v9 = vadd.f32 %v1018_v35, %v945_v63  ;;  %1295 = vmatpush1.msra.mxu1 %v1261_v61  ;;  %v1228_v21 = vsel %vm1196_vm5, %v2202_v14, 0.0  ;;  %vm397_vm6 = vcmp.eq.s32.totalorder %v2148_v55, %v2190_v10  ;;  %vm480_vm10 = vcmp.eq.s32.totalorder %v2148_v55, %v2218_v22 }
 0x11d   : > { %vm595_vm11 = vcmp.eq.s32.totalorder %v2148_v55, %v2233_v29  ;;  %v786_v33 = vadd.f32 %v754_v60, %v671_v8  ;;  %v440_v31 = vsel %vm397_vm6, %v2154_v58, 0.0  ;;  %v523_v20 = vsel %vm480_vm10, %v2168_v1, 0.0 }
 0x11e   : > { %v1155_v18 = vadd.f32 %v1123_v17, %v1050_v9  ;;  %v555_v30 = vadd.f32 %v523_v20, %v440_v31  ;;  %v638_v34 = vsel %vm595_vm11, %v2182_v5, 0.0  ;;  %vm710_vm8 = vcmp.eq.s32.totalorder %v2148_v55, %v2239_v32 }
 0x11f   : > { %vm912_vm12 = vcmp.eq.s32.totalorder %v2128_v43, %v2376_v56  ;;  %838 = vmatprep.subr.mxu0 %v786_v33  ;;  %v753_v27 = vsel %vm710_vm8, %v2199_v13, 0.0  ;;  %vm985_vm9 = vcmp.eq.s32.totalorder %v2128_v43, %v2379_v57  ;;  %vm1090_vm7 = vcmp.eq.s32.totalorder %v2128_v43, %v2383_v0 }
 0x120   : > { %v1260_v37 = vadd.f32 %v1228_v21, %v1155_v18  ;;  %v944_v38 = vsel %vm912_vm12, %v2154_v58, 0.0  ;;  %v670_v26 = vadd.f32 %v638_v34, %v555_v30  ;;  %v1017_v24 = vsel %vm985_vm9, %v2168_v1, 0.0 }
 0x121   : > { %vm1195_vm13 = vcmp.eq.s32.totalorder %v2128_v43, %v2390_v7  ;;  %v1049_v39 = vadd.f32 %v1017_v24, %v944_v38  ;;  %v1122_v19 = vsel %vm1090_vm7, %v2182_v5, 0.0  ;;  %v2785_v41 = vadd.s32 16, %v2081_v11 }
 0x122   : > { %1296 = vmatprep.subr.mxu1 %v1260_v37  ;;  %v1227_v40 = vsel %vm1195_vm13, %v2199_v13, 0.0  ;;  %v785_v47 = vadd.f32 %v753_v27, %v670_v26  ;;  %vm911_vm14 = vcmp.eq.s32.totalorder %v2131_v44, %v2343_v42  ;;  %vm984_vm15 = vcmp.eq.s32.totalorder %v2131_v44, %v2346_v46 }
 0x123   : > { %vm1089_vm0 = vcmp.eq.s32.totalorder %v2131_v44, %v2350_v59  ;;  %v1154_v43 = vadd.f32 %v1122_v19, %v1049_v39  ;;  %vm396_vm1 = vcmp.eq.s32.totalorder %v2785_v41, %v2179_v4  ;;  %vm479_vm2 = vcmp.eq.s32.totalorder %v2785_v41, %v2196_v12 }
 0x124   : > { %vm594_vm3 = vcmp.eq.s32.totalorder %v2785_v41, %v2225_v25  ;;  %839 = vmatpush1.msra.mxu0 %v785_v47  ;;  %v439_v15 = vsel %vm396_vm1, %v2161_v62, 0.0  ;;  %v522_v16 = vsel %vm479_vm2, %v2171_v2, 0.0  ;;  %vm709_vm4 = vcmp.eq.s32.totalorder %v2785_v41, %v2229_v28 }
 0x125   : > { %v637_v48 = vsel %vm594_vm3, %v2185_v6, 0.0  ;;  %v1259_v23 = vadd.f32 %v1227_v40, %v1154_v43  ;;  %v554_v49 = vadd.f32 %v522_v16, %v439_v15  ;;  %v752_v50 = vsel %vm709_vm4, %v2202_v14, 0.0 }
 0x126   : > { %v943_v51 = vsel %vm911_vm14, %v2161_v62, 0.0  ;;  %v1016_v36 = vsel %vm984_vm15, %v2171_v2, 0.0  ;;  %v1121_v53 = vsel %vm1089_vm0, %v2185_v6, 0.0  ;;  %vm1194_vm5 = vcmp.eq.s32.totalorder %v2131_v44, %v2353_v3 }
 0x127   : > { %vm395_vm6 = vcmp.eq.s32.totalorder %v2785_v41, %v2190_v10  ;;  %1297 = vmatpush1.msra.mxu1 %v1259_v23  ;;  %v669_v54 = vadd.f32 %v637_v48, %v554_v49  ;;  %v1048_v60 = vadd.f32 %v1016_v36, %v943_v51  ;;  %v1226_v61 = vsel %vm1194_vm5, %v2202_v14, 0.0 }
 0x128   : > { %v438_v63 = vsel %vm395_vm6, %v2154_v58, 0.0  ;;  %vm478_vm10 = vcmp.eq.s32.totalorder %v2785_v41, %v2218_v22  ;;  %vm593_vm11 = vcmp.eq.s32.totalorder %v2785_v41, %v2233_v29  ;;  %vm708_vm8 = vcmp.eq.s32.totalorder %v2785_v41, %v2239_v32 }
 0x129   : > { %vm910_vm12 = vcmp.eq.s32.totalorder %v2131_v44, %v2376_v56  ;;  %v784_v35 = vadd.f32 %v752_v50, %v669_v54  ;;  %v1153_v8 = vadd.f32 %v1121_v53, %v1048_v60  ;;  %v521_v9 = vsel %vm478_vm10, %v2168_v1, 0.0 }
 0x12a   : > { %v636_v17 = vsel %vm593_vm11, %v2182_v5, 0.0  ;;  %v553_v21 = vadd.f32 %v521_v9, %v438_v63  ;;  %v751_v33 = vsel %vm708_vm8, %v2199_v13, 0.0  ;;  %v942_v18 = vsel %vm910_vm12, %v2154_v58, 0.0 }
 0x12b   : > { %vm983_vm9 = vcmp.eq.s32.totalorder %v2131_v44, %v2379_v57  ;;  %840 = vmatprep.subr.mxu0 %v784_v35  ;;  %v1258_v31 = vadd.f32 %v1226_v61, %v1153_v8  ;;  %vm1088_vm7 = vcmp.eq.s32.totalorder %v2131_v44, %v2383_v0  ;;  %vm1193_vm13 = vcmp.eq.s32.totalorder %v2131_v44, %v2390_v7 }
 0x12c   : > { %v1015_v20 = vsel %vm983_vm9, %v2168_v1, 0.0  ;;  %v668_v30 = vadd.f32 %v636_v17, %v553_v21  ;;  %v1120_v37 = vsel %vm1088_vm7, %v2182_v5, 0.0  ;;  %v1225_v27 = vsel %vm1193_vm13, %v2199_v13, 0.0 }
 0x12d   : > { %v1047_v34 = vadd.f32 %v1015_v20, %v942_v18  ;;  %1298 = vmatprep.subr.mxu1 %v1258_v31  ;;  %v2836_v38 = vadd.s32 8, %v2081_v11  ;;  %vm909_vm14 = vcmp.eq.s32.totalorder %v2134_v45, %v2343_v42  ;;  %vm982_vm15 = vcmp.eq.s32.totalorder %v2134_v45, %v2346_v46 }
 0x12e   : > { %vm1087_vm0 = vcmp.eq.s32.totalorder %v2134_v45, %v2350_v59  ;;  %v783_v44 = vadd.f32 %v751_v33, %v668_v30  ;;  %v941_v24 = vsel %vm909_vm14, %v2161_v62, 0.0  ;;  %v1014_v39 = vsel %vm982_vm15, %v2171_v2, 0.0 }
 0x12f   : > { %v1152_v26 = vadd.f32 %v1120_v37, %v1047_v34  ;;  %vm394_vm1 = vcmp.eq.s32.totalorder %v2836_v38, %v2179_v4  ;;  %vm477_vm2 = vcmp.eq.s32.totalorder %v2836_v38, %v2196_v12  ;;  %vm592_vm3 = vcmp.eq.s32.totalorder %v2836_v38, %v2225_v25 }
 0x130   : > { %vm707_vm4 = vcmp.eq.s32.totalorder %v2836_v38, %v2229_v28  ;;  %841 = vmatpush1.msra.mxu0 %v783_v44  ;;  %v437_v40 = vsel %vm394_vm1, %v2161_v62, 0.0  ;;  %v520_v47 = vsel %vm477_vm2, %v2171_v2, 0.0  ;;  %v635_v43 = vsel %vm592_vm3, %v2185_v6, 0.0 }
 0x131   : > { %v1257_v19 = vadd.f32 %v1225_v27, %v1152_v26  ;;  %v552_v15 = vadd.f32 %v520_v47, %v437_v40  ;;  %v750_v16 = vsel %vm707_vm4, %v2202_v14, 0.0  ;;  %v1046_v48 = vadd.f32 %v1014_v39, %v941_v24 }
 0x132   : > { %v1119_v23 = vsel %vm1087_vm0, %v2185_v6, 0.0  ;;  %vm1192_vm5 = vcmp.eq.s32.totalorder %v2134_v45, %v2353_v3  ;;  %vm393_vm6 = vcmp.eq.s32.totalorder %v2836_v38, %v2190_v10  ;;  %vm476_vm10 = vcmp.eq.s32.totalorder %v2836_v38, %v2218_v22 }
 0x133   : > { %1299 = vmatpush1.msra.mxu1 %v1257_v19  ;;  %vm591_vm11 = vcmp.eq.s32.totalorder %v2836_v38, %v2233_v29  ;;  %v667_v49 = vadd.f32 %v635_v43, %v552_v15  ;;  %v1151_v50 = vadd.f32 %v1119_v23, %v1046_v48  ;;  %v1224_v51 = vsel %vm1192_vm5, %v2202_v14, 0.0 }
 0x134   : > { %v436_v36 = vsel %vm393_vm6, %v2154_v58, 0.0  ;;  %v519_v53 = vsel %vm476_vm10, %v2168_v1, 0.0  ;;  %v634_v54 = vsel %vm591_vm11, %v2182_v5, 0.0  ;;  %vm706_vm8 = vcmp.eq.s32.totalorder %v2836_v38, %v2239_v32 }
 0x135   : > { %vm908_vm12 = vcmp.eq.s32.totalorder %v2134_v45, %v2376_v56  ;;  %v782_v60 = vadd.f32 %v750_v16, %v667_v49  ;;  %v1256_v61 = vadd.f32 %v1224_v51, %v1151_v50  ;;  %v551_v63 = vadd.f32 %v519_v53, %v436_v36  ;;  %v811_v36 = vld [vmem:[%s226_s16] sm:$0xff] }
 0x136   : > { %v749_v35 = vsel %vm706_vm8, %v2199_v13, 0.0  ;;  %v940_v8 = vsel %vm908_vm12, %v2154_v58, 0.0  ;;  %vm981_vm9 = vcmp.eq.s32.totalorder %v2134_v45, %v2379_v57  ;;  %vm1086_vm7 = vcmp.eq.s32.totalorder %v2134_v45, %v2383_v0 }
 0x137   : > { %vm1191_vm13 = vcmp.eq.s32.totalorder %v2134_v45, %v2390_v7  ;;  %842 = vmatprep.subr.mxu0 %v782_v60  ;;  %1300 = vmatprep.subr.mxu1 %v1256_v61  ;;  %v666_v9 = vadd.f32 %v634_v54, %v551_v63  ;;  %v1013_v17 = vsel %vm981_vm9, %v2168_v1, 0.0  ;;  %v1118_v21 = vsel %vm1086_vm7, %v2182_v5, 0.0 }
 0x138   : > { %v1223_v33 = vsel %vm1191_vm13, %v2199_v13, 0.0  ;;  %v1045_v18 = vadd.f32 %v1013_v17, %v940_v8  ;;  %vm392_vm14 = vcmp.eq.s32.totalorder %v2081_v11, %v2179_v4  ;;  %vm475_vm15 = vcmp.eq.s32.totalorder %v2081_v11, %v2196_v12 }
 0x139   : > { %vm590_vm0 = vcmp.eq.s32.totalorder %v2081_v11, %v2225_v25  ;;  %v781_v45 = vadd.f32 %v749_v35, %v666_v9  ;;  %v435_v31 = vsel %vm392_vm14, %v2161_v62, 0.0  ;;  %v518_v20 = vsel %vm475_vm15, %v2171_v2, 0.0 }
 0x13a   : > { %v633_v30 = vsel %vm590_vm0, %v2185_v6, 0.0  ;;  %v1150_v34 = vadd.f32 %v1118_v21, %v1045_v18  ;;  %v550_v37 = vadd.f32 %v518_v20, %v435_v31  ;;  %vm705_vm1 = vcmp.eq.s32.totalorder %v2081_v11, %v2229_v28 }
 0x13b   : > { %vm907_vm2 = vcmp.eq.s32.totalorder %v2144_v52, %v2343_v42  ;;  %843 = vmatpush1.msra.mxu0 %v781_v45  ;;  %v748_v4 = vsel %vm705_vm1, %v2202_v14, 0.0  ;;  %vm980_vm3 = vcmp.eq.s32.totalorder %v2144_v52, %v2346_v46  ;;  %vm1085_vm4 = vcmp.eq.s32.totalorder %v2144_v52, %v2350_v59 }
 0x13c   : > { %v939_v12 = vsel %vm907_vm2, %v2161_v62, 0.0  ;;  %v1255_v25 = vadd.f32 %v1223_v33, %v1150_v34  ;;  %v665_v27 = vadd.f32 %v633_v30, %v550_v37  ;;  %v1012_v44 = vsel %vm980_vm3, %v2171_v2, 0.0 }
 0x13d   : > { %v1117_v28 = vsel %vm1085_vm4, %v2185_v6, 0.0  ;;  %v1044_v26 = vadd.f32 %v1012_v44, %v939_v12  ;;  %vm1190_vm5 = vcmp.eq.s32.totalorder %v2144_v52, %v2353_v3  ;;  %vm391_vm6 = vcmp.eq.s32.totalorder %v2081_v11, %v2190_v10 }
 0x13e   : > { %vm474_vm10 = vcmp.eq.s32.totalorder %v2081_v11, %v2218_v22  ;;  %1301 = vmatpush1.msra.mxu1 %v1255_v25  ;;  %v780_v24 = vadd.f32 %v748_v4, %v665_v27  ;;  %v1222_v39 = vsel %vm1190_vm5, %v2202_v14, 0.0  ;;  %v434_v19 = vsel %vm391_vm6, %v2154_v58, 0.0 }
 0x13f   : > { %v517_v40 = vsel %vm474_vm10, %v2168_v1, 0.0  ;;  %v1149_v47 = vadd.f32 %v1117_v28, %v1044_v26  ;;  %vm589_vm11 = vcmp.eq.s32.totalorder %v2081_v11, %v2233_v29  ;;  %vm704_vm8 = vcmp.eq.s32.totalorder %v2081_v11, %v2239_v32 }
 0x140   : > { %v549_v43 = vadd.f32 %v517_v40, %v434_v19  ;;  %844 = vmatprep.subr.mxu0 %v780_v24  ;;  %v632_v10 = vsel %vm589_vm11, %v2182_v5, 0.0  ;;  %v747_v22 = vsel %vm704_vm8, %v2199_v13, 0.0  ;;  %vm906_vm12 = vcmp.eq.s32.totalorder %v2144_v52, %v2376_v56 }
 0x141   : > { %v1254_v15 = vadd.f32 %v1222_v39, %v1149_v47  ;;  %v1822_v48 = vmov 0.0   ;;  %v938_v23 = vsel %vm906_vm12, %v2154_v58, 0.0  ;;  %vm979_vm9 = vcmp.eq.s32.totalorder %v2144_v52, %v2379_v57 }
 0x142   : > { %v664_v16 = vadd.f32 %v632_v10, %v549_v43  ;;  %878 = vmatprep.mubr.f32.mxu0 %v1822_v48  ;;  %1344 = vmatprep.mubr.f32.mxu1 %v1822_v48  ;;  %v1011_v29 = vsel %vm979_vm9, %v2168_v1, 0.0  ;;  %vm1084_vm7 = vcmp.eq.s32.totalorder %v2144_v52, %v2383_v0  ;;  %vm1189_vm13 = vcmp.eq.s32.totalorder %v2144_v52, %v2390_v7 }
 0x143   : > { %vm905_vm14 = vcmp.eq.s32.totalorder %v2148_v55, %v2343_v42  ;;  %1302 = vmatprep.subr.mxu1 %v1254_v15  ;;  %v1043_v49 = vadd.f32 %v1011_v29, %v938_v23  ;;  %v1116_v50 = vsel %vm1084_vm7, %v2182_v5, 0.0  ;;  %v1221_v51 = vsel %vm1189_vm13, %v2199_v13, 0.0 }
 0x144   : > { %v779_v32 = vadd.f32 %v747_v22, %v664_v16  ;;  %v937_v53 = vsel %vm905_vm14, %v2161_v62, 0.0  ;;  %vm978_vm15 = vcmp.eq.s32.totalorder %v2148_v55, %v2346_v46  ;;  %vm1083_vm0 = vcmp.eq.s32.totalorder %v2148_v55, %v2350_v59 }
 0x145   : > { %vm1188_vm1 = vcmp.eq.s32.totalorder %v2148_v55, %v2353_v3  ;;  %v1148_v52 = vadd.f32 %v1116_v50, %v1043_v49  ;;  %v1010_v54 = vsel %vm978_vm15, %v2171_v2, 0.0  ;;  %v1115_v60 = vsel %vm1083_vm0, %v2185_v6, 0.0 }
 0x146   : > { %845 = vmatpush1.msra.mxu0 %v779_v32  ;;  %v1220_v61 = vsel %vm1188_vm1, %v2202_v14, 0.0  ;;  %v1042_v63 = vadd.f32 %v1010_v54, %v937_v53  ;;  %vm904_vm2 = vcmp.eq.s32.totalorder %v2148_v55, %v2376_v56  ;;  %vm977_vm3 = vcmp.eq.s32.totalorder %v2148_v55, %v2379_v57  ;;  %v1277_v53 = vld [vmem:[%s226_s16 + $0x8] sm:$0xff] }
 0x147   : > { %879 = vmatmul.mubr.f32.vlgmr.msra.gmra.mxu0 %v811_v36  ;;  %vm1082_vm4 = vcmp.eq.s32.totalorder %v2148_v55, %v2383_v0  ;;  %v1253_v35 = vadd.f32 %v1221_v51, %v1148_v52  ;;  %v936_v8 = vsel %vm904_vm2, %v2154_v58, 0.0  ;;  %v1009_v9 = vsel %vm977_vm3, %v2168_v1, 0.0 }
 0x148   : > { %v1114_v17 = vsel %vm1082_vm4, %v2182_v5, 0.0  ;;  %v1147_v21 = vadd.f32 %v1115_v60, %v1042_v63  ;;  %v1041_v33 = vadd.f32 %v1009_v9, %v936_v8  ;;  %vm1187_vm5 = vcmp.eq.s32.totalorder %v2148_v55, %v2390_v7 }
 0x149   : > { %vm903_vm6 = vcmp.eq.s32.totalorder %v2785_v41, %v2343_v42  ;;  %1303 = vmatpush1.msra.mxu1 %v1253_v35  ;;  %v1219_v18 = vsel %vm1187_vm5, %v2199_v13, 0.0  ;;  %vm976_vm10 = vcmp.eq.s32.totalorder %v2785_v41, %v2346_v46  ;;  %vm1081_vm11 = vcmp.eq.s32.totalorder %v2785_v41, %v2350_v59 }
 0x14a   : > { %v935_v45 = vsel %vm903_vm6, %v2161_v62, 0.0  ;;  %v1252_v31 = vadd.f32 %v1220_v61, %v1147_v21  ;;  %v1146_v20 = vadd.f32 %v1114_v17, %v1041_v33  ;;  %v1008_v30 = vsel %vm976_vm10, %v2171_v2, 0.0 }
 0x14b   : > { %v1113_v55 = vsel %vm1081_vm11, %v2185_v6, 0.0  ;;  %v1040_v34 = vadd.f32 %v1008_v30, %v935_v45  ;;  %vm1186_vm8 = vcmp.eq.s32.totalorder %v2785_v41, %v2353_v3  ;;  %vm902_vm12 = vcmp.eq.s32.totalorder %v2785_v41, %v2376_v56 }
 0x14c   : > { %vm975_vm9 = vcmp.eq.s32.totalorder %v2785_v41, %v2379_v57  ;;  %1304 = vmatprep.subr.mxu1 %v1252_v31  ;;  %v1251_v37 = vadd.f32 %v1219_v18, %v1146_v20  ;;  %v1218_v4 = vsel %vm1186_vm8, %v2202_v14, 0.0  ;;  %v934_v12 = vsel %vm902_vm12, %v2154_v58, 0.0 }
 0x14d   : > { %v1007_v25 = vsel %vm975_vm9, %v2168_v1, 0.0  ;;  %v1145_v27 = vadd.f32 %v1113_v55, %v1040_v34  ;;  %vm1080_vm7 = vcmp.eq.s32.totalorder %v2785_v41, %v2383_v0  ;;  %vm1185_vm13 = vcmp.eq.s32.totalorder %v2785_v41, %v2390_v7 }
 0x14e   : > { %v1039_v44 = vadd.f32 %v1007_v25, %v934_v12  ;;  %1305 = vmatpush1.msra.mxu1 %v1251_v37  ;;  %v1112_v28 = vsel %vm1080_vm7, %v2182_v5, 0.0  ;;  %v1217_v26 = vsel %vm1185_vm13, %v2199_v13, 0.0  ;;  %vm901_vm14 = vcmp.eq.s32.totalorder %v2836_v38, %v2343_v42 }
 0x14f   : > { %vm974_vm15 = vcmp.eq.s32.totalorder %v2836_v38, %v2346_v46  ;;  %v1250_v24 = vadd.f32 %v1218_v4, %v1145_v27  ;;  %v933_v19 = vsel %vm901_vm14, %v2161_v62, 0.0  ;;  %vm1079_vm0 = vcmp.eq.s32.totalorder %v2836_v38, %v2350_v59 }
 0x150   : > { %v1144_v39 = vadd.f32 %v1112_v28, %v1039_v44  ;;  %v1006_v40 = vsel %vm974_vm15, %v2171_v2, 0.0  ;;  %vm1184_vm1 = vcmp.eq.s32.totalorder %v2836_v38, %v2353_v3  ;;  %vm900_vm2 = vcmp.eq.s32.totalorder %v2836_v38, %v2376_v56 }
 0x151   : > { %v1038_v47 = vadd.f32 %v1006_v40, %v933_v19  ;;  %1306 = vmatprep.subr.mxu1 %v1250_v24  ;;  %v1111_v43 = vsel %vm1079_vm0, %v2185_v6, 0.0  ;;  %v1216_v10 = vsel %vm1184_vm1, %v2202_v14, 0.0  ;;  %v932_v22 = vsel %vm900_vm2, %v2154_v58, 0.0 }
 0x152   : > { %v1249_v41 = vadd.f32 %v1217_v26, %v1144_v39  ;;  %vm973_vm3 = vcmp.eq.s32.totalorder %v2836_v38, %v2379_v57  ;;  %vm1078_vm4 = vcmp.eq.s32.totalorder %v2836_v38, %v2383_v0  ;;  %vm1183_vm5 = vcmp.eq.s32.totalorder %v2836_v38, %v2390_v7 }
 0x153   : > { %v1143_v15 = vadd.f32 %v1111_v43, %v1038_v47  ;;  %v1005_v16 = vsel %vm973_vm3, %v2168_v1, 0.0  ;;  %v1110_v48 = vsel %vm1078_vm4, %v2182_v5, 0.0  ;;  %v1215_v23 = vsel %vm1183_vm5, %v2199_v13, 0.0 }
 0x154   : > { %1307 = vmatpush1.msra.mxu1 %v1249_v41  ;;  %vm899_vm6 = vcmp.eq.s32.totalorder %v2081_v11, %v2343_v42  ;;  %v1037_v32 = vadd.f32 %v1005_v16, %v932_v22  ;;  %vm972_vm10 = vcmp.eq.s32.totalorder %v2081_v11, %v2346_v46  ;;  %vm1077_vm11 = vcmp.eq.s32.totalorder %v2081_v11, %v2350_v59 }
 0x155   : > { %v1248_v29 = vadd.f32 %v1216_v10, %v1143_v15  ;;  %v931_v49 = vsel %vm899_vm6, %v2161_v62, 0.0  ;;  %v1004_v50 = vsel %vm972_vm10, %v2171_v2, 0.0  ;;  %vm1182_vm8 = vcmp.eq.s32.totalorder %v2081_v11, %v2353_v3 }
 0x156   : > { %vm898_vm12 = vcmp.eq.s32.totalorder %v2081_v11, %v2376_v56  ;;  %v1142_v42 = vadd.f32 %v1110_v48, %v1037_v32  ;;  %v1036_v38 = vadd.f32 %v1004_v50, %v931_v49  ;;  %v1109_v51 = vsel %vm1077_vm11, %v2185_v6, 0.0 }
 0x157   : > { %1308 = vmatprep.subr.mxu1 %v1248_v29  ;;  %v1214_v62 = vsel %vm1182_vm8, %v2202_v14, 0.0  ;;  %v930_v46 = vsel %vm898_vm12, %v2154_v58, 0.0  ;;  %vm971_vm9 = vcmp.eq.s32.totalorder %v2081_v11, %v2379_v57  ;;  %vm1076_vm7 = vcmp.eq.s32.totalorder %v2081_v11, %v2383_v0 }
 0x158   : > { %vm1181_vm13 = vcmp.eq.s32.totalorder %v2081_v11, %v2390_v7  ;;  %v1247_v2 = vadd.f32 %v1215_v23, %v1142_v42  ;;  %v1141_v59 = vadd.f32 %v1109_v51, %v1036_v38  ;;  %v1003_v3 = vsel %vm971_vm9, %v2168_v1, 0.0  ;;  %v812_v11 = vld [vmem:[#allocation2] sm:$0xff]  ;;  %v813_v7 = vld [vmem:[#allocation2 + $0x8] sm:$0xff] }
 0x159   : > { %v1108_v6 = vsel %vm1076_vm7, %v2182_v5, 0.0  ;;  %v1035_v56 = vadd.f32 %v1003_v3, %v930_v46  ;;  %v1213_v58 = vsel %vm1181_vm13, %v2199_v13, 0.0 }
 0x15a   : > { %1309 = vmatpush1.msra.mxu1 %v1247_v2  ;;  %v1246_v14 = vadd.f32 %v1214_v62, %v1141_v59 }
 0x15b   : > { %v1140_v36 = vadd.f32 %v1108_v6, %v1035_v56 }
 0x15c   : > { %1310 = vmatprep.subr.mxu1 %v1246_v14 }
 0x15d   : > { %v1245_v57 = vadd.f32 %v1213_v58, %v1140_v36 }
 0x15f   : > { %1311 = vmatpush1.msra.mxu1 %v1245_v57 }
 0x160   : > { %1345 = vmatmul.mubr.f32.vlgmr.msra.gmra.mxu1 %v1277_v53 }
 0x207   : > { %v880_v0 = vpop.f32.mrf.mxu0 }
 0x208   : > { %v885_v54 = vadd.f32 %v880_v0, %v812_v11 }
 0x209   : > { %v882_v52 = vpop.f32.mrf.mxu0 }
 0x20a   : > { %v886_v1 = vadd.f32 %v882_v52, %v813_v7 }
 0x220   : > { %v1346_v60 = vpop.f32.mrf.mxu1 }
 0x221   : > { %v1351_v5 = vadd.f32 %v1346_v60, %v885_v54 }
 0x222   : > { %v1348_v61 = vpop.f32.mrf.mxu1 }
 0x223   : > { %1353 = vst [vmem:[#allocation2] sm:$0xff] %v1351_v5  ;;  %v1352_v63 = vadd.f32 %v1348_v61, %v886_v1 }
 0x225   : > { %1354 = vst [vmem:[#allocation2 + $0x8] sm:$0xff] %v1352_v63 }
 0x226 PF: > { %s3136_s8 = sld [smem:[#allocation25_spill]]  ;;  %s1521_s30 = sshll.u32 %s1807_s27, 8 }
 0x227   : > { %s3137_s24 = sld [smem:[#allocation27_spill]]  ;;  %s1379_s15 = sshll.u32 %s2079_s6, 4  ;;  %s1380_s15 = int_to_ptr.vmem [resolvable:$true] %s1379_s15 }
 0x228   : > { %s1363_s20 = scalar_lea.sflag [#allocation8], %s2068_s11  ;;  %s1705_s12 = scalar_lea.vmem %s1380_s15, 256 }
 0x229   : > { %p1706_p9 = scmp.ne.s32.totalorder %s1380_s15, %s1705_s12  ;;  %s1823_s10 = smov [#allocation11]  }
 0x22a   : > { %v1358_v13 = vld [vmem:[#allocation2] sm:$0xff]  ;;  %s1709_s22 = sshll.u32 %s1823_s10, 4  ;;  %s1710_s22 = int_to_ptr.vmem [resolvable:$false] %s1709_s22 }
 0x22b   : > { %1360 = vst [vmem:[%s2079_s6] sm:$0xff] %v1358_v13  ;;  %s1711_s16 = scalar_lea.vmem %s1710_s22, 512  ;;  %p1712_p4 = scmp.lt.s32.totalorder %s1380_s15, %s1710_s22 }
 0x22c   : > { %v1359_v35 = vld [vmem:[#allocation2 + $0x8] sm:$0xff]  ;;  %p3139_p7 = scmp.ne.s32.totalorder %s3136_s8, 0  ;;  %p1713_p0 = scmp.lt.s32.totalorder %s1711_s16, %s1705_s12 }
 0x22d   : > { %1361 = vst [vmem:[%s2079_s6 + $0x8] sm:$0xff] %v1359_v35  ;;  %s3138_s19 = smov %s3137_s24  ;;  %s1377_s18 = scalar_lea.hbm %s3137_s24, %s1521_s30 }
 0x22e   : > { %p1707_p13 = pnand %p1706_p9, %p3139_p7  ;;  %p1714_p3 = por %p1713_p0, %p1712_p4 }
 0x230   : > { %p1708_p11 = pneg %p1707_p13 }
 0x232   : > { %p1715_p8 = pnand %p1714_p3, %p1708_p11 }
 0x234   : > { %1718 = shalt.err (!%p1715_p8)
}
 0x235   : > { %s1719_s27 = scalar_lea.hbm %s1377_s18, 256  ;;  %s1723_s17 = scalar_lea.hbm %s3138_s19, 512 }
 0x236   : > { %p1720_p5 = scmp.ne.s32.totalorder %s1377_s18, %s1719_s27  ;;  %p1724_p10 = scmp.lt.s32.totalorder %s1377_s18, %s3138_s19 }
 0x237   : > { %p1725_p2 = scmp.lt.s32.totalorder %s1723_s17, %s1719_s27 }
 0x238   : > { %p1721_p6 = pnand %p1720_p5, %p3139_p7 }
 0x239   : > { %p1726_p12 = por %p1725_p2, %p1724_p10 }
 0x23a   : > { %p1722_p1 = pneg %p1721_p6 }
 0x23c   : > { %p1727_p9 = pnand %p1726_p12, %p1722_p1 }
 0x23e   : > { %1730 = shalt.err (!%p1727_p9)
}
 0x23f   : > { %1534 = dma.vmem_to_hbm [thread:$0]  (%p3139_p7), %s1380_s15, 256, %s1377_s18, %s1363_s20  }
 0x240 PF: > { %s3140_s14 = sld [smem:[#allocation20_spill]]  ;;  %p3143_p11 = scmp.ge.s32.totalorder %s1815_s29, 2 }
 0x241   : > { %s3141_s5 = sld [smem:[#allocation26_spill]] }
 0x246   : > { %s1391_s7 = sand.u32 1, %s3140_s14  }
 0x247   : > { %p3142_p13 = scmp.ne.s32.totalorder %s3141_s5, 0  ;;  %s1392_s6 = scalar_lea.sflag [#allocation8], %s1391_s7 }
 0x249   : > { %p1548_p4 = pnand %p3143_p11, %p3142_p13 }
 0x24b   : > { %p1549_p0 = pneg %p1548_p4 }
 0x24d   : > { %1778 = dma.done.wait (%p1549_p0), %s1392_s6, 256  }
 0x24e   : > { %1780 = vsyncadd (%p1549_p0), %s1392_s6, 4294967040  ;;  %s31_s29 = sadd.s32 1, %s1815_s29   ;;  %s3144_s21 = sld [smem:[#allocation24_spill]] }
 0x24f   : > { %p28_p3 = scmp.ge.s32.totalorder %s31_s29, 4   ;;  %s3145_s8 = sld [smem:[#allocation23_spill]] }
 0x250   : > { %s3146_s27 = sld [smem:[#allocation21_spill]]  ;;  %s3148_s0 = smov %s1787_s1 }
 0x251   : > { %s3147_s28 = sld [smem:[#allocation22_spill]]  ;;  %s3149_s1 = smov %s1791_s23 }
 0x252   : > { %s3151_s24 = smov %s1799_s25  ;;  %s3152_s25 = smov %s1803_s26 }
 0x253   :  { %30 = sbr.rel (!%p28_p3) target bundleno = 26 (0x1a), region = 99 }
 0x254   : > { %s3150_s23 = smov %s3144_s21 }
 0x255   : > { %s3153_s26 = smov %s3145_s8 }
 0x258   :  { %1397 = vsyncpa [#allocation7], 1 }
 0x259   :  { %1399 = vsyncpa [#allocation7 + $0x1], 1 }
 0x25a   :  { %1400 = vsyncpa [#allocation10], 1 }
 0x25b   :  { %1402 = vsyncpa [#allocation10 + $0x1], 1 }
 0x25c   :  { %1403 = vsyncpa [#allocation8], 1 }
 0x25d   :  { %1405 = vsyncpa [#allocation8 + $0x1], 1 }

</bundles_post_ra>
